<compile_context>
chip_gen: v6e
topology: v6e:2x2x1
jax: 0.10.0
libtpu: 0.0.40
codegen_flags: <defaults>
</compile_context>

<pallas_src>
import functools

import jax
import jax.numpy as jnp
from jax.experimental import pallas as pl
from jax.experimental.pallas import tpu as pltpu

VMEM = pl.BlockSpec(memory_space=pltpu.MemorySpace.VMEM)
ANY = pl.BlockSpec(memory_space=pl.ANY)
EPS = 1e-5
OUT_PAD = 128   # pad the narrow classifier output to a full lane group


# ---------------- fused Pallas kernel (the whole forward pass) ----------------

def _m3_fused_kernel(a_gcn_ref, a_mean_ref, pool_ref, x_ref,
                     w1_ref, t1_ref,
                     w2_ref, t2_ref,
                     w3_ref, t3_ref,
                     w4l_hbm, w4r_hbm, t4_ref,
                     w5_hbm, t5_ref,
                     w6_hbm, t6_ref,
                     o_ref,
                     w4l_vmem, w4r_vmem, w5_vmem, w6_vmem, dma_sems):
    bf16 = jnp.bfloat16
    dot = lambda a, b: jnp.dot(a, b, preferred_element_type=jnp.float32)

    # Kick off HBM->VMEM prefetch of the late-layer weights at kernel entry;
    # the copies complete under the three GCN layers' compute (manual overlap,
    # pattern P4).  Waits sit immediately before first use.
    cp4l = pltpu.make_async_copy(w4l_hbm, w4l_vmem, dma_sems.at[0]); cp4l.start()
    cp4r = pltpu.make_async_copy(w4r_hbm, w4r_vmem, dma_sems.at[1]); cp4r.start()
    cp5 = pltpu.make_async_copy(w5_hbm, w5_vmem, dma_sems.at[2]); cp5.start()
    cp6 = pltpu.make_async_copy(w6_hbm, w6_vmem, dma_sems.at[3]); cp6.start()

    # GCN operator loaded once, reused by conv1 / conv2 / conv3.
    a_gcn = a_gcn_ref[...]

    def gcn(h, w, shift, relu):
        # Association rule (static, trace-time): contract the O(N^2)
        # aggregation matmul over the narrower feature width.
        if w.shape[1] >= h.shape[1]:
            z = dot(dot(a_gcn, h).astype(bf16), w)      # (A @ X) @ W
        else:
            z = dot(a_gcn, dot(h, w).astype(bf16))      # A @ (X @ W)
        y = z + shift                                   # f32 epilogue (BN scale folded into w)
        if relu:
            y = jnp.maximum(y, 0.0)
        return y.astype(bf16)

    # TODO(synk): dropout layers are identity (eval mode); BatchNorm uses
    # running statistics, scale folded into the bf16 weights, shift as f32 add.
    h = x_ref[...].astype(bf16)                                      # (N, f) bf16
    h = gcn(h, w1_ref[...], t1_ref[...], True)                       # conv1+bn1+relu  (N, 64)
    h = gcn(h, w2_ref[...], t2_ref[...], True)                       # conv2+bn2+relu  (N, 128)
    h = gcn(h, w3_ref[...], t3_ref[...], False)                      # conv3 (+bias)   (N, 128)

    # SAGEConv(mean) + bn3 + relu as two accumulating dots (no concat copy);
    # h @ Wr is independent of A_mean @ h, so the MXU can overlap them.
    agg = dot(a_mean_ref[...], h).astype(bf16)                       # (N, 128)
    cp4l.wait()
    cp4r.wait()
    z = dot(agg, w4l_vmem[...]) + dot(h, w4r_vmem[...])              # (N, 256) f32
    h = jnp.maximum(z + t4_ref[...], 0.0).astype(bf16)

    # global_mean_pool fused with lin1 + bn4 + relu
    pooled = dot(pool_ref[...], h).astype(bf16)                      # (B, 256)
    cp5.wait()
    z = dot(pooled, w5_vmem[...])                                    # (B, 512) f32
    h = jnp.maximum(z + t5_ref[...], 0.0).astype(bf16)

    # lin2 classifier: lane-padded to 128 outputs (dense vst); caller slices.
    cp6.wait()
    o_ref[...] = dot(h, w6_vmem[...]) + t6_ref[...]


# ---------------- jitted wrapper around the single pallas_call ----------------

@jax.jit
def m3_forward(x, a_gcn_bf, a_mean_bf, pool_bf, prep):
    """Returns lane-padded logits of shape (batch, OUT_PAD); slice [:, :C] outside."""
    n, f = x.shape
    b = pool_bf.shape[0]

    args = (a_gcn_bf, a_mean_bf, pool_bf, x,
            prep["w1"], prep["t1"],
            prep["w2"], prep["t2"],
            prep["w3"], prep["t3"],
            prep["w4l"], prep["w4r"], prep["t4"],
            prep["w5"], prep["t5"],
            prep["w6"], prep["t6"])

    # Whole-array VMEM residency (inputs + prefetched weight scratch) is
    # correct at this size: total footprint < 2 MiB, far below every chip's
    # VMEM.  For graphs with thousands of nodes, switch to a two-axis tiled
    # grid over A_gcn/A_mean (contraction axis last, row axis "parallel" so
    # v7x's second TensorCore participates), re-derive tile sizes against a
    # 64 MiB VMEM budget on v7x, and optionally store the [0,1]-valued
    # operators in fp8 on v7x only.  Trace-time guard only (does not count
    # compiler temporaries) -- do not rely on it when scaling N.
    total_bytes = sum(a.size * a.dtype.itemsize for a in args)
    assert total_bytes < 8 * 1024 * 1024, "operands too large for whole-array VMEM residency"

    # Advisory cost estimate for XLA's scheduler around the custom call.
    d1, d2, d3 = prep["w1"].shape[1], prep["w2"].shape[1], prep["w3"].shape[1]
    d4, d5, d6 = prep["w4l"].shape[1], prep["w5"].shape[1], prep["w6"].shape[1]
    flops = 2 * (n * n * f + n * f * d1
                 + n * n * d1 + n * d1 * d2
                 + n * n * d2 + n * d2 * d3
                 + n * n * d3 + 2 * n * d3 * d4
                 + b * n * d4 + b * d4 * d5
                 + b * d5 * d6)
    bytes_accessed = int(total_bytes + b * d6 * 4)

    in_specs = [VMEM] * 10 + [ANY, ANY, VMEM, ANY, VMEM, ANY, VMEM]

    out_pad = pl.pallas_call(
        _m3_fused_kernel,
        out_shape=jax.ShapeDtypeStruct((b, OUT_PAD), jnp.float32),
        in_specs=in_specs,
        out_specs=VMEM,
        scratch_shapes=[
            pltpu.VMEM(prep["w4l"].shape, jnp.bfloat16),
            pltpu.VMEM(prep["w4r"].shape, jnp.bfloat16),
            pltpu.VMEM(prep["w5"].shape, jnp.bfloat16),
            pltpu.VMEM(prep["w6"].shape, jnp.bfloat16),
            pltpu.SemaphoreType.DMA((4,)),
        ],
        cost_estimate=pl.CostEstimate(flops=flops, transcendentals=0,
                                      bytes_accessed=bytes_accessed),
    )(*args)
    return out_pad


# ---------------- one-time parameter / operator preparation ----------------

def prepare_params(p, num_features, num_classes):
    """Load-time prep (off the inference path): fold eval-mode BatchNorm scale
    into the weight columns and its shift into the bias, zero-pad the narrow
    classifier output to 128 lanes, and cast matmul operands to bf16 (f32
    accumulation happens in the kernel)."""
    bf16 = jnp.bfloat16

    def fold(bias, bn):
        gamma, beta, mean, var = bn
        s = gamma / jnp.sqrt(var + EPS)                       # per-output-channel scale
        t = (bias - mean) * s + beta                          # folded shift
        return s, t.reshape(1, -1).astype(jnp.float32)

    s1, t1 = fold(p["b1"], p["bn1"])
    s2, t2 = fold(p["b2"], p["bn2"])
    s4, t4 = fold(p["b4"], p["bn3"])
    s5, t5 = fold(p["b5"], p["bn4"])

    w1 = (p["w1"] * s1[None, :]).astype(bf16)
    w2 = (p["w2"] * s2[None, :]).astype(bf16)
    w3 = p["w3"].astype(bf16)
    w4l = (p["w4l"] * s4[None, :]).astype(bf16)
    w4r = (p["w4r"] * s4[None, :]).astype(bf16)
    w5 = (p["w5"] * s5[None, :]).astype(bf16)
    w6 = jnp.zeros((p["w6"].shape[0], OUT_PAD), jnp.float32).at[:, :num_classes].set(p["w6"])
    t6 = jnp.zeros((1, OUT_PAD), jnp.float32).at[0, :num_classes].set(p["b6"])

    return {
        "w1": w1, "t1": t1,
        "w2": w2, "t2": t2,
        "w3": w3, "t3": p["b3"].reshape(1, -1).astype(jnp.float32),
        "w4l": w4l, "w4r": w4r, "t4": t4,
        "w5": w5, "t5": t5,
        "w6": w6.astype(bf16), "t6": t6,
    }


def prepare_operators(a_gcn, a_mean, pool_mat):
    bf16 = jnp.bfloat16
    return a_gcn.astype(bf16), a_mean.astype(bf16), pool_mat.astype(bf16)


# ---------------- parameter helpers ----------------

def glorot(key, shape):
    fan_in, fan_out = shape
    lim = (6.0 / (fan_in + fan_out)) ** 0.5
    return jax.random.uniform(key, shape, jnp.float32, -lim, lim)


def bn_params(key, dim):
    k1, k2, k3, k4 = jax.random.split(key, 4)
    gamma = 1.0 + 0.1 * jax.random.normal(k1, (dim,), jnp.float32)
    beta = 0.1 * jax.random.normal(k2, (dim,), jnp.float32)
    mean = 0.05 * jax.random.normal(k3, (dim,), jnp.float32)
    var = 0.5 + jnp.abs(jax.random.normal(k4, (dim,), jnp.float32))
    return gamma, beta, mean, var


# ---------------- pure-JAX references for validation ----------------

def m3_reference_f32(x, a_gcn, a_mean, pool_mat, p):
    def bn(z, g, b, m, v):
        return (z - m) / jnp.sqrt(v + EPS) * g + b

    h = jax.nn.relu(bn(a_gcn @ x @ p["w1"] + p["b1"], *p["bn1"]))
    h = jax.nn.relu(bn(a_gcn @ h @ p["w2"] + p["b2"], *p["bn2"]))
    h = a_gcn @ h @ p["w3"] + p["b3"]
    h = jax.nn.relu(bn((a_mean @ h) @ p["w4l"] + p["b4"] + h @ p["w4r"], *p["bn3"]))
    h = pool_mat @ h
    h = jax.nn.relu(bn(h @ p["w5"] + p["b5"], *p["bn4"]))
    return h @ p["w6"] + p["b6"]


def m3_reference_matched(x, a_gcn, a_mean, pool_mat, prep, num_classes):
    """Pure-JAX mirror of the fused kernel's bf16-operand / f32-accumulate numerics."""
    bf16 = jnp.bfloat16
    dot = lambda a, b: jnp.dot(a, b, preferred_element_type=jnp.float32)
    ag, am, pm = a_gcn.astype(bf16), a_mean.astype(bf16), pool_mat.astype(bf16)
    h = x.astype(bf16)

    def gcn(h, w, shift, relu):
        if w.shape[1] >= h.shape[1]:
            z = dot(dot(ag, h).astype(bf16), w)
        else:
            z = dot(ag, dot(h, w).astype(bf16))
        y = z + shift
        if relu:
            y = jnp.maximum(y, 0.0)
        return y.astype(bf16)

    h = gcn(h, prep["w1"], prep["t1"], True)
    h = gcn(h, prep["w2"], prep["t2"], True)
    h = gcn(h, prep["w3"], prep["t3"], False)
    agg = dot(am, h).astype(bf16)
    z = dot(agg, prep["w4l"]) + dot(h, prep["w4r"])
    h = jnp.maximum(z + prep["t4"], 0.0).astype(bf16)
    pooled = dot(pm, h).astype(bf16)
    z = dot(pooled, prep["w5"])
    h = jnp.maximum(z + prep["t5"], 0.0).astype(bf16)
    return (dot(h, prep["w6"]) + prep["t6"])[:, :num_classes]


if __name__ == "__main__":
    key = jax.random.PRNGKey(0)
    num_features, num_classes = 8, 4
    num_nodes, batch_size = 16, 2

    # ----- graph: two 8-node rings, undirected -----
    src, dst = [], []
    for g in range(batch_size):
        base = g * 8
        for i in range(8):
            u, v = base + i, base + (i + 1) % 8
            src += [u, v]
            dst += [v, u]
    src = jnp.array(src, jnp.int32)
    dst = jnp.array(dst, jnp.int32)
    batch = jnp.array([0] * 8 + [1] * 8, jnp.int32)

    # A[i, j] = 1 if there is an edge j -> i (aggregate at target i)
    A = jnp.zeros((num_nodes, num_nodes), jnp.float32).at[dst, src].set(1.0)

    # GCN normalized operator: D^{-1/2} (A + I) D^{-1/2}
    A_t = A + jnp.eye(num_nodes, dtype=jnp.float32)
    dinv = 1.0 / jnp.sqrt(A_t.sum(axis=1))
    A_gcn = dinv[:, None] * A_t * dinv[None, :]

    # SAGE mean-aggregation operator (no self loops)
    deg = A.sum(axis=1, keepdims=True)
    A_mean = jnp.where(deg > 0, A / jnp.maximum(deg, 1.0), 0.0)

    # global_mean_pool as a (batch_size, num_nodes) matrix
    P = (batch[None, :] == jnp.arange(batch_size)[:, None]).astype(jnp.float32)
    P = P / P.sum(axis=1, keepdims=True)

    # ----- deterministic parameters -----
    keys = jax.random.split(key, 20)
    params = {
        "w1": glorot(keys[0], (num_features, 64)), "b1": 0.01 * jax.random.normal(keys[1], (64,)),
        "bn1": bn_params(keys[2], 64),
        "w2": glorot(keys[3], (64, 128)), "b2": 0.01 * jax.random.normal(keys[4], (128,)),
        "bn2": bn_params(keys[5], 128),
        "w3": glorot(keys[6], (128, 128)), "b3": 0.01 * jax.random.normal(keys[7], (128,)),
        "w4l": glorot(keys[8], (128, 256)), "w4r": glorot(keys[9], (128, 256)),
        "b4": 0.01 * jax.random.normal(keys[10], (256,)),
        "bn3": bn_params(keys[11], 256),
        "w5": glorot(keys[12], (256, 512)), "b5": 0.01 * jax.random.normal(keys[13], (512,)),
        "bn4": bn_params(keys[14], 512),
        "w6": glorot(keys[15], (512, num_classes)),
        "b6": 0.01 * jax.random.normal(keys[16], (num_classes,)),
    }

    x = jax.random.normal(keys[17], (num_nodes, num_features), jnp.float32)

    # one-time prep (BN folding into weights, lane padding, bf16 casts) — off the hot path
    prep = prepare_params(params, num_features, num_classes)
    a_gcn_bf, a_mean_bf, pool_bf = prepare_operators(A_gcn, A_mean, P)

    out_pad = m3_forward(x, a_gcn_bf, a_mean_bf, pool_bf, prep)
    out_pad = jax.block_until_ready(out_pad)
    out = out_pad[:, :num_classes]

    ref_bf16 = m3_reference_matched(x, A_gcn, A_mean, P, prep, num_classes)
    ref_f32 = m3_reference_f32(x, A_gcn, A_mean, P, params)

    assert out.shape == (batch_size, num_classes)
    # tight check vs a reference with identical bf16-operand / f32-accumulate numerics
    assert jnp.allclose(out, ref_bf16, atol=1e-2, rtol=1e-2), "mismatch vs bf16-matched reference"
    # sanity check vs the full-f32 reference (bounds the bf16 / BN-folding error)
    assert jnp.allclose(out, ref_f32, atol=5e-2, rtol=5e-2), "mismatch vs f32 reference"

    print("KERNEL_OK")
</pallas_src>

<mosaic_0001>
module attributes {stable_mosaic.version = 11 : i64} {
  func.func @_m3_fused_kernel(%arg0: memref<16x16xbf16, #tpu.memory_space<vmem>>, %arg1: memref<16x16xbf16, #tpu.memory_space<vmem>>, %arg2: memref<2x16xbf16, #tpu.memory_space<vmem>>, %arg3: memref<16x8xf32, #tpu.memory_space<vmem>>, %arg4: memref<8x64xbf16, #tpu.memory_space<vmem>>, %arg5: memref<1x64xf32, #tpu.memory_space<vmem>>, %arg6: memref<64x128xbf16, #tpu.memory_space<vmem>>, %arg7: memref<1x128xf32, #tpu.memory_space<vmem>>, %arg8: memref<128x128xbf16, #tpu.memory_space<vmem>>, %arg9: memref<1x128xf32, #tpu.memory_space<vmem>>, %arg10: memref<128x256xbf16, #tpu.memory_space<any>>, %arg11: memref<128x256xbf16, #tpu.memory_space<any>>, %arg12: memref<1x256xf32, #tpu.memory_space<vmem>>, %arg13: memref<256x512xbf16, #tpu.memory_space<any>>, %arg14: memref<1x512xf32, #tpu.memory_space<vmem>>, %arg15: memref<512x128xbf16, #tpu.memory_space<any>>, %arg16: memref<1x128xf32, #tpu.memory_space<vmem>>, %arg17: memref<2x128xf32, #tpu.memory_space<vmem>>, %arg18: memref<128x256xbf16, #tpu.memory_space<vmem>>, %arg19: memref<128x256xbf16, #tpu.memory_space<vmem>>, %arg20: memref<256x512xbf16, #tpu.memory_space<vmem>>, %arg21: memref<512x128xbf16, #tpu.memory_space<vmem>>, %arg22: memref<4x!tpu.dma_semaphore, #tpu.memory_space<semaphore_mem>>) attributes {dimension_semantics = [], scalar_prefetch = 0 : i64, scratch_operands = 5 : i64, tpu.core_type = #tpu.core_type<tc>} {
    %c0_i32 = arith.constant 0 : i32
    %0 = tpu.memref_slice %arg22[%c0_i32] : memref<4x!tpu.dma_semaphore, #tpu.memory_space<semaphore_mem>> -> memref<1x!tpu.dma_semaphore, #tpu.memory_space<semaphore_mem>>
    %1 = tpu.memref_squeeze %0 : memref<1x!tpu.dma_semaphore, #tpu.memory_space<semaphore_mem>> -> memref<!tpu.dma_semaphore, #tpu.memory_space<semaphore_mem>>
    tpu.enqueue_dma source(%arg10 : memref<128x256xbf16, #tpu.memory_space<any>>) target(%arg18 : memref<128x256xbf16, #tpu.memory_space<vmem>>) target_semaphore(%1 : memref<!tpu.dma_semaphore, #tpu.memory_space<semaphore_mem>>)
    %c1_i32 = arith.constant 1 : i32
    %2 = tpu.memref_slice %arg22[%c1_i32] : memref<4x!tpu.dma_semaphore, #tpu.memory_space<semaphore_mem>> -> memref<1x!tpu.dma_semaphore, #tpu.memory_space<semaphore_mem>>
    %3 = tpu.memref_squeeze %2 : memref<1x!tpu.dma_semaphore, #tpu.memory_space<semaphore_mem>> -> memref<!tpu.dma_semaphore, #tpu.memory_space<semaphore_mem>>
    tpu.enqueue_dma source(%arg11 : memref<128x256xbf16, #tpu.memory_space<any>>) target(%arg19 : memref<128x256xbf16, #tpu.memory_space<vmem>>) target_semaphore(%3 : memref<!tpu.dma_semaphore, #tpu.memory_space<semaphore_mem>>)
    %c2_i32 = arith.constant 2 : i32
    %4 = tpu.memref_slice %arg22[%c2_i32] : memref<4x!tpu.dma_semaphore, #tpu.memory_space<semaphore_mem>> -> memref<1x!tpu.dma_semaphore, #tpu.memory_space<semaphore_mem>>
    %5 = tpu.memref_squeeze %4 : memref<1x!tpu.dma_semaphore, #tpu.memory_space<semaphore_mem>> -> memref<!tpu.dma_semaphore, #tpu.memory_space<semaphore_mem>>
    tpu.enqueue_dma source(%arg13 : memref<256x512xbf16, #tpu.memory_space<any>>) target(%arg20 : memref<256x512xbf16, #tpu.memory_space<vmem>>) target_semaphore(%5 : memref<!tpu.dma_semaphore, #tpu.memory_space<semaphore_mem>>)
    %c3_i32 = arith.constant 3 : i32
    %6 = tpu.memref_slice %arg22[%c3_i32] : memref<4x!tpu.dma_semaphore, #tpu.memory_space<semaphore_mem>> -> memref<1x!tpu.dma_semaphore, #tpu.memory_space<semaphore_mem>>
    %7 = tpu.memref_squeeze %6 : memref<1x!tpu.dma_semaphore, #tpu.memory_space<semaphore_mem>> -> memref<!tpu.dma_semaphore, #tpu.memory_space<semaphore_mem>>
    tpu.enqueue_dma source(%arg15 : memref<512x128xbf16, #tpu.memory_space<any>>) target(%arg21 : memref<512x128xbf16, #tpu.memory_space<vmem>>) target_semaphore(%7 : memref<!tpu.dma_semaphore, #tpu.memory_space<semaphore_mem>>)
    %c0 = arith.constant 0 : index
    %c0_0 = arith.constant 0 : index
    %8 = vector.load %arg0[%c0, %c0_0] : memref<16x16xbf16, #tpu.memory_space<vmem>>, vector<16x16xbf16>
    %c0_1 = arith.constant 0 : index
    %c0_2 = arith.constant 0 : index
    %9 = vector.load %arg3[%c0_1, %c0_2] : memref<16x8xf32, #tpu.memory_space<vmem>>, vector<16x8xf32>
    %10 = arith.truncf %9 : vector<16x8xf32> to vector<16x8xbf16>
    %c0_3 = arith.constant 0 : index
    %c0_4 = arith.constant 0 : index
    %11 = vector.load %arg4[%c0_3, %c0_4] : memref<8x64xbf16, #tpu.memory_space<vmem>>, vector<8x64xbf16>
    %c0_5 = arith.constant 0 : index
    %c0_6 = arith.constant 0 : index
    %12 = vector.load %arg5[%c0_5, %c0_6] : memref<1x64xf32, #tpu.memory_space<vmem>>, vector<1x64xf32>
    %cst = arith.constant dense<0.000000e+00> : vector<16x8xf32>
    %13 = tpu.matmul %8, %10, %cst {dimension_numbers = #tpu.dot_dimension_numbers<[1], [0], [0], [1], [0, 0, 1, 1], [], []>} : vector<16x16xbf16>, vector<16x8xbf16>, vector<16x8xf32> -> vector<16x8xf32>
    %14 = arith.truncf %13 : vector<16x8xf32> to vector<16x8xbf16>
    %cst_7 = arith.constant dense<0.000000e+00> : vector<16x64xf32>
    %15 = tpu.matmul %14, %11, %cst_7 {dimension_numbers = #tpu.dot_dimension_numbers<[1], [0], [0], [1], [0, 0, 1, 1], [], []>} : vector<16x8xbf16>, vector<8x64xbf16>, vector<16x64xf32> -> vector<16x64xf32>
    %16 = vector.broadcast %12 : vector<1x64xf32> to vector<16x64xf32>
    %17 = arith.addf %15, %16 : vector<16x64xf32>
    %cst_8 = arith.constant 0.000000e+00 : f32
    %18 = vector.broadcast %cst_8 : f32 to vector<16x64xf32>
    %19 = arith.maximumf %17, %18 : vector<16x64xf32>
    %20 = arith.truncf %19 : vector<16x64xf32> to vector<16x64xbf16>
    %c0_9 = arith.constant 0 : index
    %c0_10 = arith.constant 0 : index
    %21 = vector.load %arg6[%c0_9, %c0_10] : memref<64x128xbf16, #tpu.memory_space<vmem>>, vector<64x128xbf16>
    %c0_11 = arith.constant 0 : index
    %c0_12 = arith.constant 0 : index
    %22 = vector.load %arg7[%c0_11, %c0_12] : memref<1x128xf32, #tpu.memory_space<vmem>>, vector<1x128xf32>
    %cst_13 = arith.constant dense<0.000000e+00> : vector<16x64xf32>
    %23 = tpu.matmul %8, %20, %cst_13 {dimension_numbers = #tpu.dot_dimension_numbers<[1], [0], [0], [1], [0, 0, 1, 1], [], []>} : vector<16x16xbf16>, vector<16x64xbf16>, vector<16x64xf32> -> vector<16x64xf32>
    %24 = arith.truncf %23 : vector<16x64xf32> to vector<16x64xbf16>
    %cst_14 = arith.constant dense<0.000000e+00> : vector<16x128xf32>
    %25 = tpu.matmul %24, %21, %cst_14 {dimension_numbers = #tpu.dot_dimension_numbers<[1], [0], [0], [1], [0, 0, 1, 1], [], []>} : vector<16x64xbf16>, vector<64x128xbf16>, vector<16x128xf32> -> vector<16x128xf32>
    %26 = vector.broadcast %22 : vector<1x128xf32> to vector<16x128xf32>
    %27 = arith.addf %25, %26 : vector<16x128xf32>
    %cst_15 = arith.constant 0.000000e+00 : f32
    %28 = vector.broadcast %cst_15 : f32 to vector<16x128xf32>
    %29 = arith.maximumf %27, %28 : vector<16x128xf32>
    %30 = arith.truncf %29 : vector<16x128xf32> to vector<16x128xbf16>
    %c0_16 = arith.constant 0 : index
    %c0_17 = arith.constant 0 : index
    %31 = vector.load %arg8[%c0_16, %c0_17] : memref<128x128xbf16, #tpu.memory_space<vmem>>, vector<128x128xbf16>
    %c0_18 = arith.constant 0 : index
    %c0_19 = arith.constant 0 : index
    %32 = vector.load %arg9[%c0_18, %c0_19] : memref<1x128xf32, #tpu.memory_space<vmem>>, vector<1x128xf32>
    %cst_20 = arith.constant dense<0.000000e+00> : vector<16x128xf32>
    %33 = tpu.matmul %8, %30, %cst_20 {dimension_numbers = #tpu.dot_dimension_numbers<[1], [0], [0], [1], [0, 0, 1, 1], [], []>} : vector<16x16xbf16>, vector<16x128xbf16>, vector<16x128xf32> -> vector<16x128xf32>
    %34 = arith.truncf %33 : vector<16x128xf32> to vector<16x128xbf16>
    %cst_21 = arith.constant dense<0.000000e+00> : vector<16x128xf32>
    %35 = tpu.matmul %34, %31, %cst_21 {dimension_numbers = #tpu.dot_dimension_numbers<[1], [0], [0], [1], [0, 0, 1, 1], [], []>} : vector<16x128xbf16>, vector<128x128xbf16>, vector<16x128xf32> -> vector<16x128xf32>
    %36 = vector.broadcast %32 : vector<1x128xf32> to vector<16x128xf32>
    %37 = arith.addf %35, %36 : vector<16x128xf32>
    %38 = arith.truncf %37 : vector<16x128xf32> to vector<16x128xbf16>
    %c0_22 = arith.constant 0 : index
    %c0_23 = arith.constant 0 : index
    %39 = vector.load %arg1[%c0_22, %c0_23] : memref<16x16xbf16, #tpu.memory_space<vmem>>, vector<16x16xbf16>
    %cst_24 = arith.constant dense<0.000000e+00> : vector<16x128xf32>
    %40 = tpu.matmul %39, %38, %cst_24 {dimension_numbers = #tpu.dot_dimension_numbers<[1], [0], [0], [1], [0, 0, 1, 1], [], []>} : vector<16x16xbf16>, vector<16x128xbf16>, vector<16x128xf32> -> vector<16x128xf32>
    %41 = arith.truncf %40 : vector<16x128xf32> to vector<16x128xbf16>
    %c0_i32_25 = arith.constant 0 : i32
    %42 = tpu.memref_slice %arg22[%c0_i32_25] : memref<4x!tpu.dma_semaphore, #tpu.memory_space<semaphore_mem>> -> memref<1x!tpu.dma_semaphore, #tpu.memory_space<semaphore_mem>>
    %43 = tpu.memref_squeeze %42 : memref<1x!tpu.dma_semaphore, #tpu.memory_space<semaphore_mem>> -> memref<!tpu.dma_semaphore, #tpu.memory_space<semaphore_mem>>
    tpu.wait_dma2 semaphore(%43 : memref<!tpu.dma_semaphore, #tpu.memory_space<semaphore_mem>>) src(%arg10 : memref<128x256xbf16, #tpu.memory_space<any>>) dst(%arg18 : memref<128x256xbf16, #tpu.memory_space<vmem>>)
    %c1_i32_26 = arith.constant 1 : i32
    %44 = tpu.memref_slice %arg22[%c1_i32_26] : memref<4x!tpu.dma_semaphore, #tpu.memory_space<semaphore_mem>> -> memref<1x!tpu.dma_semaphore, #tpu.memory_space<semaphore_mem>>
    %45 = tpu.memref_squeeze %44 : memref<1x!tpu.dma_semaphore, #tpu.memory_space<semaphore_mem>> -> memref<!tpu.dma_semaphore, #tpu.memory_space<semaphore_mem>>
    tpu.wait_dma2 semaphore(%45 : memref<!tpu.dma_semaphore, #tpu.memory_space<semaphore_mem>>) src(%arg11 : memref<128x256xbf16, #tpu.memory_space<any>>) dst(%arg19 : memref<128x256xbf16, #tpu.memory_space<vmem>>)
    %c0_27 = arith.constant 0 : index
    %c0_28 = arith.constant 0 : index
    %46 = vector.load %arg18[%c0_27, %c0_28] : memref<128x256xbf16, #tpu.memory_space<vmem>>, vector<128x256xbf16>
    %cst_29 = arith.constant dense<0.000000e+00> : vector<16x256xf32>
    %47 = tpu.matmul %41, %46, %cst_29 {dimension_numbers = #tpu.dot_dimension_numbers<[1], [0], [0], [1], [0, 0, 1, 1], [], []>} : vector<16x128xbf16>, vector<128x256xbf16>, vector<16x256xf32> -> vector<16x256xf32>
    %c0_30 = arith.constant 0 : index
    %c0_31 = arith.constant 0 : index
    %48 = vector.load %arg19[%c0_30, %c0_31] : memref<128x256xbf16, #tpu.memory_space<vmem>>, vector<128x256xbf16>
    %cst_32 = arith.constant dense<0.000000e+00> : vector<16x256xf32>
    %49 = tpu.matmul %38, %48, %cst_32 {dimension_numbers = #tpu.dot_dimension_numbers<[1], [0], [0], [1], [0, 0, 1, 1], [], []>} : vector<16x128xbf16>, vector<128x256xbf16>, vector<16x256xf32> -> vector<16x256xf32>
    %50 = arith.addf %47, %49 : vector<16x256xf32>
    %c0_33 = arith.constant 0 : index
    %c0_34 = arith.constant 0 : index
    %51 = vector.load %arg12[%c0_33, %c0_34] : memref<1x256xf32, #tpu.memory_space<vmem>>, vector<1x256xf32>
    %52 = vector.broadcast %51 : vector<1x256xf32> to vector<16x256xf32>
    %53 = arith.addf %50, %52 : vector<16x256xf32>
    %cst_35 = arith.constant 0.000000e+00 : f32
    %54 = vector.broadcast %cst_35 : f32 to vector<16x256xf32>
    %55 = arith.maximumf %53, %54 : vector<16x256xf32>
    %56 = arith.truncf %55 : vector<16x256xf32> to vector<16x256xbf16>
    %c0_36 = arith.constant 0 : index
    %c0_37 = arith.constant 0 : index
    %57 = vector.load %arg2[%c0_36, %c0_37] : memref<2x16xbf16, #tpu.memory_space<vmem>>, vector<2x16xbf16>
    %cst_38 = arith.constant dense<0.000000e+00> : vector<2x256xf32>
    %58 = tpu.matmul %57, %56, %cst_38 {dimension_numbers = #tpu.dot_dimension_numbers<[1], [0], [0], [1], [0, 0, 1, 1], [], []>} : vector<2x16xbf16>, vector<16x256xbf16>, vector<2x256xf32> -> vector<2x256xf32>
    %59 = arith.truncf %58 : vector<2x256xf32> to vector<2x256xbf16>
    %c2_i32_39 = arith.constant 2 : i32
    %60 = tpu.memref_slice %arg22[%c2_i32_39] : memref<4x!tpu.dma_semaphore, #tpu.memory_space<semaphore_mem>> -> memref<1x!tpu.dma_semaphore, #tpu.memory_space<semaphore_mem>>
    %61 = tpu.memref_squeeze %60 : memref<1x!tpu.dma_semaphore, #tpu.memory_space<semaphore_mem>> -> memref<!tpu.dma_semaphore, #tpu.memory_space<semaphore_mem>>
    tpu.wait_dma2 semaphore(%61 : memref<!tpu.dma_semaphore, #tpu.memory_space<semaphore_mem>>) src(%arg13 : memref<256x512xbf16, #tpu.memory_space<any>>) dst(%arg20 : memref<256x512xbf16, #tpu.memory_space<vmem>>)
    %c0_40 = arith.constant 0 : index
    %c0_41 = arith.constant 0 : index
    %62 = vector.load %arg20[%c0_40, %c0_41] : memref<256x512xbf16, #tpu.memory_space<vmem>>, vector<256x512xbf16>
    %cst_42 = arith.constant dense<0.000000e+00> : vector<2x512xf32>
    %63 = tpu.matmul %59, %62, %cst_42 {dimension_numbers = #tpu.dot_dimension_numbers<[1], [0], [0], [1], [0, 0, 1, 1], [], []>} : vector<2x256xbf16>, vector<256x512xbf16>, vector<2x512xf32> -> vector<2x512xf32>
    %c0_43 = arith.constant 0 : index
    %c0_44 = arith.constant 0 : index
    %64 = vector.load %arg14[%c0_43, %c0_44] : memref<1x512xf32, #tpu.memory_space<vmem>>, vector<1x512xf32>
    %65 = vector.broadcast %64 : vector<1x512xf32> to vector<2x512xf32>
    %66 = arith.addf %63, %65 : vector<2x512xf32>
    %cst_45 = arith.constant 0.000000e+00 : f32
    %67 = vector.broadcast %cst_45 : f32 to vector<2x512xf32>
    %68 = arith.maximumf %66, %67 : vector<2x512xf32>
    %69 = arith.truncf %68 : vector<2x512xf32> to vector<2x512xbf16>
    %c3_i32_46 = arith.constant 3 : i32
    %70 = tpu.memref_slice %arg22[%c3_i32_46] : memref<4x!tpu.dma_semaphore, #tpu.memory_space<semaphore_mem>> -> memref<1x!tpu.dma_semaphore, #tpu.memory_space<semaphore_mem>>
    %71 = tpu.memref_squeeze %70 : memref<1x!tpu.dma_semaphore, #tpu.memory_space<semaphore_mem>> -> memref<!tpu.dma_semaphore, #tpu.memory_space<semaphore_mem>>
    tpu.wait_dma2 semaphore(%71 : memref<!tpu.dma_semaphore, #tpu.memory_space<semaphore_mem>>) src(%arg15 : memref<512x128xbf16, #tpu.memory_space<any>>) dst(%arg21 : memref<512x128xbf16, #tpu.memory_space<vmem>>)
    %c0_47 = arith.constant 0 : index
    %c0_48 = arith.constant 0 : index
    %72 = vector.load %arg21[%c0_47, %c0_48] : memref<512x128xbf16, #tpu.memory_space<vmem>>, vector<512x128xbf16>
    %cst_49 = arith.constant dense<0.000000e+00> : vector<2x128xf32>
    %73 = tpu.matmul %69, %72, %cst_49 {dimension_numbers = #tpu.dot_dimension_numbers<[1], [0], [0], [1], [0, 0, 1, 1], [], []>} : vector<2x512xbf16>, vector<512x128xbf16>, vector<2x128xf32> -> vector<2x128xf32>
    %c0_50 = arith.constant 0 : index
    %c0_51 = arith.constant 0 : index
    %74 = vector.load %arg16[%c0_50, %c0_51] : memref<1x128xf32, #tpu.memory_space<vmem>>, vector<1x128xf32>
    %75 = vector.broadcast %74 : vector<1x128xf32> to vector<2x128xf32>
    %76 = arith.addf %73, %75 : vector<2x128xf32>
    %c0_52 = arith.constant 0 : index
    %c0_53 = arith.constant 0 : index
    %77 = vector.load %arg17[%c0_52, %c0_53] : memref<2x128xf32, #tpu.memory_space<vmem>>, vector<2x128xf32>
    tpu.vector_store %arg17[%c0_52, %c0_53], %76 {strides = array<i32>} : memref<2x128xf32, #tpu.memory_space<vmem>>, vector<2x128xf32>,
    return
  }
}

</mosaic_0001>

<bundles_post_ra>
// kernel: m3_forward.1
= control target key start
LH: loop header
LB: loop body
LE: loop exit
PB: predicated region body
PF: predicated region fallthrough
CT: control target
= control target key end

     0   :  { %s2956_s0 = inlined_call_operand.vmem [shape: bf16[16,16], index: 0, kind: input, shape index: {}]   ;;  %s2957_s1 = inlined_call_operand.hbm [shape: bf16[16,16], index: 1, kind: input, shape index: {}]   ;;  %s2958_s2 = inlined_call_operand.hbm [shape: bf16[2,16], index: 2, kind: input, shape index: {}]   ;;  %s2959_s3 = inlined_call_operand.vmem [shape: f32[16,8], index: 3, kind: input, shape index: {}]   ;;  %s2960_s4 = inlined_call_operand.vmem [shape: bf16[8,64], index: 4, kind: input, shape index: {}]   ;;  %s2961_s5 = inlined_call_operand.hbm [shape: f32[1,64], index: 5, kind: input, shape index: {}]   ;;  %s2962_s6 = inlined_call_operand.vmem [shape: bf16[64,128], index: 6, kind: input, shape index: {}]   ;;  %s2963_s7 = inlined_call_operand.hbm [shape: f32[1,128], index: 7, kind: input, shape index: {}]   ;;  %s2964_s8 = inlined_call_operand.hbm [shape: bf16[128,128], index: 8, kind: input, shape index: {}]   ;;  %s2965_s9 = inlined_call_operand.hbm [shape: f32[1,128], index: 9, kind: input, shape index: {}]   ;;  %s2966_s10 = inlined_call_operand.hbm [shape: bf16[128,256], index: 10, kind: input, shape index: {}]   ;;  %s2967_s11 = inlined_call_operand.hbm [shape: bf16[128,256], index: 11, kind: input, shape index: {}]   ;;  %s2968_s12 = inlined_call_operand.hbm [shape: f32[1,256], index: 12, kind: input, shape index: {}]   ;;  %s2969_s13 = inlined_call_operand.hbm [shape: bf16[256,512], index: 13, kind: input, shape index: {}]   ;;  %s2970_s14 = inlined_call_operand.hbm [shape: f32[1,512], index: 14, kind: input, shape index: {}]   ;;  %s2971_s15 = inlined_call_operand.hbm [shape: bf16[512,128], index: 15, kind: input, shape index: {}]   ;;  %s2972_s16 = inlined_call_operand.hbm [shape: f32[1,128], index: 16, kind: input, shape index: {}]   ;;  %s2973_s17 = inlined_call_operand.hbm [shape: f32[2,128], index: 17, kind: output, shape index: {}]  }
   0x1   :  { %2974 = sst [smem:[#allocation43_spill]] %s2956_s0 }
   0x2   :  { %2975 = sst [smem:[#allocation44_spill]] %s2957_s1 }
   0x3   :  { %22 = vsyncpa [#allocation8], 0 }
   0x4   :  { %23 = vsyncpa [#allocation11], 0 }
   0x5   :  { %24 = vsyncpa [#allocation14], 0 }
   0x6   :  { %25 = vsyncpa [#allocation17], 0 }
   0x7   :  { %26 = vsyncpa [#allocation20], 0 }
   0x8   :  { %27 = vsyncpa [#allocation9], 0  ;;  %s2700_s24 = smov [#allocation10]   ;;  %s2701_s26 = smov [#allocation13]  }
   0x9   :  { %s48_s25 = sshll.u32 %s2700_s24, 4  ;;  %s74_s27 = sshll.u32 %s2701_s26, 4  ;;  %s49_s25 = int_to_ptr.vmem [resolvable:$true] %s48_s25  ;;  %s75_s27 = int_to_ptr.vmem [resolvable:$true] %s74_s27 }
   0xa   :  { %s2408_s28 = scalar_lea.vmem %s49_s25, 16  ;;  %s2412_s29 = scalar_lea.vmem %s49_s25, 32 }
   0xb   :  { %p2409_p0 = scmp.ne.s32.totalorder %s49_s25, %s2408_s28  ;;  %p2413_p1 = scmp.lt.s32.totalorder %s49_s25, %s49_s25 }
   0xc   :  { %p2414_p2 = scmp.lt.s32.totalorder %s2412_s29, %s2408_s28 }
   0xe   :  { %p2415_p3 = por %p2414_p2, %p2413_p1 }
  0x10   :  { %p2416_p4 = pnand %p2415_p3, %p2409_p0 }
  0x12   :  { %2419 = shalt.err (!%p2416_p4)
}
  0x13   :  { %51 = dma.hbm_to_vmem [thread:$0]  %s2958_s2, 16, %s49_s25, [#allocation11]  }
  0x14   :  { %s2428_s18 = scalar_lea.vmem %s75_s27, 16  ;;  %s2432_s19 = scalar_lea.vmem %s75_s27, 32 }
  0x15   :  { %p2429_p5 = scmp.ne.s32.totalorder %s75_s27, %s2428_s18  ;;  %p2433_p6 = scmp.lt.s32.totalorder %s75_s27, %s75_s27 }
  0x16   :  { %p2434_p7 = scmp.lt.s32.totalorder %s2432_s19, %s2428_s18 }
  0x18   :  { %p2435_p8 = por %p2434_p7, %p2433_p6 }
  0x1a   :  { %p2436_p9 = pnand %p2435_p8, %p2429_p5 }
  0x1c   :  { %2439 = shalt.err (!%p2436_p9)
}
  0x1d   :  { %77 = dma.hbm_to_vmem [thread:$0]  %s2963_s7, 16, %s75_s27, [#allocation14]  }
  0x1e   :  { %s2702_s21 = smov [#allocation16]   ;;  %s2703_s23 = smov [#allocation19]  }
  0x1f   :  { %s96_s22 = sshll.u32 %s2702_s21, 4  ;;  %s116_s24 = sshll.u32 %s2703_s23, 4  ;;  %s97_s22 = int_to_ptr.vmem [resolvable:$true] %s96_s22  ;;  %s117_s24 = int_to_ptr.vmem [resolvable:$true] %s116_s24 }
  0x20   :  { %s2448_s26 = scalar_lea.vmem %s97_s22, 16  ;;  %s2452_s2 = scalar_lea.vmem %s97_s22, 32 }
  0x21   :  { %p2449_p10 = scmp.ne.s32.totalorder %s97_s22, %s2448_s26  ;;  %p2453_p11 = scmp.lt.s32.totalorder %s97_s22, %s97_s22 }
  0x22   :  { %p2454_p12 = scmp.lt.s32.totalorder %s2452_s2, %s2448_s26 }
  0x24   :  { %p2455_p13 = por %p2454_p12, %p2453_p11 }
  0x26   :  { %p2456_p0 = pnand %p2455_p13, %p2449_p10 }
  0x28   :  { %2459 = shalt.err (!%p2456_p0)
}
  0x29   :  { %99 = dma.hbm_to_vmem [thread:$0]  %s2965_s9, 16, %s97_s22, [#allocation17]  }
  0x2a   :  { %s2468_s29 = scalar_lea.vmem %s117_s24, 64  ;;  %p2473_p2 = scmp.lt.s32.totalorder %s117_s24, %s117_s24 }
  0x2b   :  { %p2469_p1 = scmp.ne.s32.totalorder %s117_s24, %s2468_s29  ;;  %p2474_p3 = scmp.lt.s32.totalorder %s2468_s29, %s2468_s29 }
  0x2d   :  { %p2475_p4 = por %p2474_p3, %p2473_p2 }
  0x2f   :  { %p2476_p5 = pnand %p2475_p4, %p2469_p1 }
  0x31   :  { %2479 = shalt.err (!%p2476_p5)
}
  0x32   :  { %119 = dma.hbm_to_vmem [thread:$0]  %s2970_s14, 64, %s117_s24, [#allocation20]  }
  0x33   :  { %s2704_s0 = smov [#allocation7]  }
  0x34   :  { %s35_s30 = sshll.u32 %s2704_s0, 4  ;;  %s36_s30 = int_to_ptr.vmem [resolvable:$true] %s35_s30 }
  0x35   :  { %s2488_s18 = scalar_lea.vmem %s36_s30, 128  ;;  %p2493_p7 = scmp.lt.s32.totalorder %s36_s30, %s36_s30 }
  0x36   :  { %p2489_p6 = scmp.ne.s32.totalorder %s36_s30, %s2488_s18  ;;  %p2494_p8 = scmp.lt.s32.totalorder %s2488_s18, %s2488_s18 }
  0x38   :  { %p2495_p9 = por %p2494_p8, %p2493_p7 }
  0x3a   :  { %p2496_p10 = pnand %p2495_p9, %p2489_p6 }
  0x3c   :  { %2499 = shalt.err (!%p2496_p10)
}
  0x3d   :  { %s2705_s9 = smov 64   ;;  %s2706_s19 = smov 4  }
  0x3e   :  { %s2976_s21 = sld [smem:[#allocation44_spill]]  ;;  %s2707_s22 = smov [#allocation12]  }
  0x3f   :  { %s62_s23 = sshll.u32 %s2707_s22, 4  ;;  %s2708_s14 = smov [#allocation15]   ;;  %s63_s23 = int_to_ptr.vmem [resolvable:$true] %s62_s23 }
  0x40   :  { %s83_s24 = sshll.u32 %s2708_s14, 4  ;;  %s2508_s26 = scalar_lea.vmem %s63_s23, 16  ;;  %s84_s24 = int_to_ptr.vmem [resolvable:$true] %s83_s24 }
  0x41   :  { %p2509_p11 = scmp.ne.s32.totalorder %s63_s23, %s2508_s26  ;;  %s2512_s2 = scalar_lea.vmem %s63_s23, 32 }
  0x42   :  { %p2513_p12 = scmp.lt.s32.totalorder %s63_s23, %s63_s23  ;;  %p2514_p13 = scmp.lt.s32.totalorder %s2512_s2, %s2508_s26 }
  0x44   :  { %41 = dma.hbm_to_vmem [thread:$0]  %s2976_s21, 128, %s36_s30, [#allocation8], %s2705_s9, %s2705_s9, %s2706_s19  }
  0x45   :  { %p2515_p0 = por %p2514_p13, %p2513_p12 }
  0x47   :  { %p2516_p1 = pnand %p2515_p0, %p2509_p11 }
  0x49   :  { %2519 = shalt.err (!%p2516_p1)
}
  0x4a   :  { %65 = dma.hbm_to_vmem [thread:$0]  %s2961_s5, 16, %s63_s23, [#allocation11]  }
  0x4b   :  { %s2528_s29 = scalar_lea.vmem %s84_s24, 1024  ;;  %p2533_p3 = scmp.lt.s32.totalorder %s84_s24, %s84_s24 }
  0x4c   :  { %p2529_p2 = scmp.ne.s32.totalorder %s84_s24, %s2528_s29  ;;  %p2534_p4 = scmp.lt.s32.totalorder %s2528_s29, %s2528_s29 }
  0x4e   :  { %p2535_p5 = por %p2534_p4, %p2533_p3 }
  0x50   :  { %p2536_p6 = pnand %p2535_p5, %p2529_p2 }
  0x52   :  { %2539 = shalt.err (!%p2536_p6)
}
  0x53   :  { %89 = dma.hbm_to_vmem [thread:$0]  %s2964_s8, 1024, %s84_s24, [#allocation14], %s2705_s9, %s2705_s9, %s2706_s19  }
  0x54   :  { %s2709_s0 = smov [#allocation18]   ;;  %s2710_s18 = smov [#allocation21]  }
  0x55   :  { %s106_s30 = sshll.u32 %s2709_s0, 4  ;;  %s126_s1 = sshll.u32 %s2710_s18, 4  ;;  %s107_s30 = int_to_ptr.vmem [resolvable:$true] %s106_s30  ;;  %s127_s1 = int_to_ptr.vmem [resolvable:$true] %s126_s1 }
  0x56   :  { %s2548_s20 = scalar_lea.vmem %s107_s30, 32  ;;  %p2553_p8 = scmp.lt.s32.totalorder %s107_s30, %s107_s30 }
  0x57   :  { %p2549_p7 = scmp.ne.s32.totalorder %s107_s30, %s2548_s20  ;;  %p2554_p9 = scmp.lt.s32.totalorder %s2548_s20, %s2548_s20 }
  0x59   :  { %p2555_p10 = por %p2554_p9, %p2553_p8 }
  0x5b   :  { %p2556_p11 = pnand %p2555_p10, %p2549_p7 }
  0x5d   :  { %2559 = shalt.err (!%p2556_p11)
}
  0x5e   :  { %109 = dma.hbm_to_vmem [thread:$0]  %s2968_s12, 32, %s107_s30, [#allocation17]  }
  0x5f   :  { %s2568_s22 = scalar_lea.vmem %s127_s1, 16  ;;  %s2572_s8 = scalar_lea.vmem %s127_s1, 32 }
  0x60   :  { %p2569_p12 = scmp.ne.s32.totalorder %s127_s1, %s2568_s22  ;;  %p2573_p13 = scmp.lt.s32.totalorder %s127_s1, %s127_s1 }
  0x61   :  { %p2574_p0 = scmp.lt.s32.totalorder %s2572_s8, %s2568_s22 }
  0x63   :  { %p2575_p1 = por %p2574_p0, %p2573_p13 }
  0x65   :  { %p2576_p2 = pnand %p2575_p1, %p2569_p12 }
  0x67   :  { %2579 = shalt.err (!%p2576_p2)
}
  0x68   :  { %129 = dma.hbm_to_vmem [thread:$0]  %s2972_s16, 16, %s127_s1, [#allocation20]  }
  0x69   :  { %2680 = dma.done.wait [#allocation8], 128  }
  0x6a   :  { %2681 = vsyncadd [#allocation8], 4294967168 }
  0x6b   :  { %2682 = dma.done.wait [#allocation11], 32  }
  0x6c   :  { %2683 = vsyncadd [#allocation11], 4294967264 }
  0x6d   :  { %2684 = dma.done.wait [#allocation14], 1040  }
  0x6e   :  { %2685 = vsyncadd [#allocation14], 4294966256 }
  0x6f   :  { %2686 = dma.done.wait [#allocation17], 48  }
  0x70   :  { %2687 = vsyncadd [#allocation17], 4294967248 }
  0x71   :  { %2688 = dma.done.wait [#allocation20], 80  }
  0x72   :  { %2689 = vsyncadd [#allocation20], 4294967216  ;;  %v2711_v0 = vmov 0.0   ;;  %vm2712_vm0 = vmmov 0   ;;  %v207_v1 = vld [vmem:[%s2959_s3] sm:$0xff]  ;;  %v208_v2 = vld [vmem:[%s2959_s3 + $0x8] sm:$0xff] }
  0x73   :  { %2129 = vmatprep.subr.bf16.mxu1 %v2711_v0  ;;  %2131 = vmatprep.mubr.msk.bf16.mxu1 %vm2712_vm0, %v2711_v0  ;;  %v209_v3 = vpack.c.bf16 %v208_v2, %v207_v1  ;;  %s2977_s2 = sld [smem:[#allocation43_spill]]  ;;  %vm217_vm1 = vcmask 130048   ;;  %v210_v5 = vld [vmem:[%s2960_s4] sm:$0xf]  ;;  %vm273_vm2 = vcmask 1043456   ;;  %vm269_vm3 = vcmask 64512  }
  0x74   :  { %2141 = vmatprep.subr.bf16.mxu0 %v2711_v0  ;;  %2143 = vmatprep.mubr.msk.bf16.mxu0 %vm2712_vm0, %v2711_v0  ;;  %v275_v6 = vsel %vm273_vm2, %v210_v5, 0  ;;  %v2211_v12 = vld [vmem:[%s2962_s6 + $0x18] sm:$0xff]   ;;  %v2212_v13 = vld [vmem:[%s2962_s6 + $0x10] sm:$0xff]   ;;  %v1906_v14 = vld [vmem:[#allocation12] ss:$0 sm:$0xff]  ;;  %vm402_vm4 = vcmask 523264  }
  0x75   :  { %2130 = vmatpush3.bf16.msra.mxu1 %v209_v3  ;;  %v2213_v24 = vld [vmem:[%s2962_s6 + $0x8] sm:$0xff]   ;;  %v2214_v25 = vld [vmem:[%s2962_s6] sm:$0xff]   ;;  %v2217_v43 = vld [vmem:[#allocation15 + $0x28] sm:$0xff]   ;;  %s2713_s6 = smov [#allocation2]   ;;  %s2714_s20 = smov [#allocation3]  }
  0x76   :  { %2135 = vmatprep.subr.bf16.mxu1 %v2711_v0  ;;  %v1909_v31 = vld [vmem:[#allocation13] ss:$0 sm:$0xff]  ;;  %v2216_v42 = vld [vmem:[#allocation15 + $0x30] sm:$0xff]   ;;  %v2218_v44 = vld [vmem:[#allocation15 + $0x20] sm:$0xff]   ;;  %s165_s1 = sshll.u32 %s2713_s6, 4  ;;  %s177_s5 = sshll.u32 %s2714_s20, 4  ;;  %s166_s1 = int_to_ptr.vmem [resolvable:$true] %s165_s1  ;;  %s178_s5 = int_to_ptr.vmem [resolvable:$true] %s177_s5 }
  0x77   :  { %v2215_v41 = vld [vmem:[#allocation15 + $0x38] sm:$0xff]   ;;  %v2220_v46 = vld [vmem:[#allocation15 + $0x10] sm:$0xff]   ;;  %v2221_v47 = vld [vmem:[#allocation15 + $0x8] sm:$0xff]   ;;  %s2588_s21 = scalar_lea.vmem %s166_s1, 2048  ;;  %p2593_p4 = scmp.lt.s32.totalorder %s166_s1, %s166_s1 }
  0x78   :  { %v2219_v45 = vld [vmem:[#allocation15 + $0x18] sm:$0xff]   ;;  %v2222_v48 = vld [vmem:[#allocation15] sm:$0xff]   ;;  %p2589_p3 = scmp.ne.s32.totalorder %s166_s1, %s2588_s21  ;;  %p2594_p5 = scmp.lt.s32.totalorder %s2588_s21, %s2588_s21 }
  0x79   :  { %v2851_v4 = vld [vmem:[%s2977_s2] sm:$0xff]   ;;  %v1916_v55 = vld [vmem:[#allocation16] ss:$0 sm:$0xff] }
  0x7a   :  { %2132 = vmatmul.mubr.msk.bf16.vlgmr.msra.gmra.mxu1 %vm217_vm1, %v2851_v4  ;;  %v2223_v62 = vld [vmem:[#allocation7] sm:$0xff]   ;;  %p2595_p6 = por %p2594_p5, %p2593_p4 }
  0x7b   :  { %2137 = vmatprep.mubr.msk.bf16.mxu1 %vm2712_vm0, %v2711_v0  ;;  %2136 = vmatpush3.bf16.msra.mxu1 %v275_v6 }
  0x7c   :  { %2147 = vmatprep.subr.bf16.mxu1 %v2711_v0  ;;  %p2596_p7 = pnand %p2595_p6, %p2589_p3 }
 0x13a   :  { %v255_v7 = vpop.f32.mrf.mxu1 }
 0x13c   :  { %v2133_v8 = vpop.f32.mrf.mxu1 }
 0x13e   :  { %v258_v9 = vpop.f32.mrf.mxu1 }
 0x13f   :  { %v262_v10 = vpack.c.bf16 %v258_v9, %v255_v7 }
 0x140   :  { %v2134_v11 = vpop.f32.mrf.mxu1 }
 0x141   :  { %2138 = vmatmul.mubr.msk.bf16.vlgmr.msra.gmra.mxu1 %vm269_vm3, %v262_v10 }
 0x142   :  { %2155 = vmatprep.mubr.msk.bf16.mxu1 %vm2712_vm0, %v2711_v0  ;;  %2148 = vmatpush3.bf16.msra.mxu1 %v2211_v12 }
 0x143   :  { %2149 = vmatprep.subr.bf16.mxu1 %v2711_v0 }
 0x146   :  { %2150 = vmatpush3.bf16.msra.mxu1 %v2212_v13 }
 0x147   :  { %2151 = vmatprep.subr.bf16.mxu1 %v2711_v0 }
 0x14a   :  { %2152 = vmatpush3.bf16.msra.mxu1 %v2213_v24 }
 0x14b   :  { %2153 = vmatprep.subr.bf16.mxu1 %v2711_v0 }
 0x14e   :  { %2154 = vmatpush3.bf16.msra.mxu1 %v2214_v25 }
 0x14f   :  { %2185 = vmatprep.subr.bf16.mxu1 %v2711_v0 }
 0x201   :  { %v311_v15 = vpop.f32.mrf.mxu1 }
 0x202   :  { %v312_v17 = vadd.f32 %v1906_v14, %v311_v15 }
 0x203   :  { %v2139_v16 = vpop.f32.mrf.mxu1 }
 0x204   :  { %v318_v21 = vmax.f32 %v312_v17, 0.0 }
 0x205   :  { %v314_v18 = vpop.f32.mrf.mxu1 }
 0x206   :  { %v315_v19 = vadd.f32 %v1906_v14, %v314_v18 }
 0x207   :  { %v2140_v20 = vpop.f32.mrf.mxu1 }
 0x208   :  { %v319_v22 = vmax.f32 %v315_v19, 0.0 }
 0x20a   :  { %v320_v23 = vpack.c.bf16 %v319_v22, %v318_v21 }
 0x20c   :  { %2142 = vmatpush3.bf16.msra.mxu0 %v320_v23 }
 0x20d   :  { %2159 = vmatprep.subr.bf16.mxu0 %v2711_v0 }
 0x20f   :  { %2144 = vmatmul.mubr.msk.bf16.vlgmr.msra.gmra.mxu0 %vm217_vm1, %v2851_v4 }
 0x210   :  { %2161 = vmatprep.mubr.msk.bf16.mxu0 %vm2712_vm0, %v2711_v0 }
 0x2cf   :  { %v364_v26 = vpop.f32.mrf.mxu0 }
 0x2d1   :  { %v2145_v27 = vpop.f32.mrf.mxu0 }
 0x2d3   :  { %v367_v28 = vpop.f32.mrf.mxu0 }
 0x2d4   :  { %v371_v29 = vpack.c.bf16 %v367_v28, %v364_v26 }
 0x2d5   :  { %v2146_v30 = vpop.f32.mrf.mxu0 }
 0x2d6   :  { %2156 = vmatmul.mubr.msk.bf16.vlgmr.msra.gmra.mxu1 %vm402_vm4, %v371_v29 }
 0x2d7   :  { %2187 = vmatprep.mubr.msk.bf16.mxu1 %vm2712_vm0, %v2711_v0 }
 0x396   :  { %v440_v32 = vpop.f32.mrf.mxu1 }
 0x397   :  { %v441_v34 = vadd.f32 %v1909_v31, %v440_v32 }
 0x398   :  { %v2157_v33 = vpop.f32.mrf.mxu1 }
 0x399   :  { %v447_v38 = vmax.f32 %v441_v34, 0.0 }
 0x39a   :  { %v443_v35 = vpop.f32.mrf.mxu1 }
 0x39b   :  { %v444_v36 = vadd.f32 %v1909_v31, %v443_v35 }
 0x39c   :  { %v2158_v37 = vpop.f32.mrf.mxu1 }
 0x39d   :  { %v448_v39 = vmax.f32 %v444_v36, 0.0 }
 0x39f   :  { %v449_v40 = vpack.c.bf16 %v448_v39, %v447_v38 }
 0x3a1   :  { %2160 = vmatpush3.bf16.msra.mxu0 %v449_v40 }
 0x3a2   :  { %2165 = vmatprep.subr.bf16.mxu0 %v2711_v0 }
 0x3a4   :  { %2162 = vmatmul.mubr.msk.bf16.vlgmr.msra.gmra.mxu0 %vm217_vm1, %v2851_v4 }
 0x3a5   :  { %2166 = vmatpush3.bf16.msra.mxu0 %v2215_v41  ;;  %2181 = vmatprep.mubr.msk.bf16.mxu0 %vm2712_vm0, %v2711_v0 }
 0x3a6   :  { %2167 = vmatprep.subr.bf16.mxu0 %v2711_v0 }
 0x3a9   :  { %2168 = vmatpush3.bf16.msra.mxu0 %v2216_v42 }
 0x3aa   :  { %2169 = vmatprep.subr.bf16.mxu0 %v2711_v0 }
 0x3ad   :  { %2170 = vmatpush3.bf16.msra.mxu0 %v2217_v43 }
 0x3ae   :  { %2171 = vmatprep.subr.bf16.mxu0 %v2711_v0 }
 0x3b1   :  { %2172 = vmatpush3.bf16.msra.mxu0 %v2218_v44 }
 0x3b2   :  { %2173 = vmatprep.subr.bf16.mxu0 %v2711_v0 }
 0x3b5   :  { %2174 = vmatpush3.bf16.msra.mxu0 %v2219_v45 }
 0x3b6   :  { %2175 = vmatprep.subr.bf16.mxu0 %v2711_v0 }
 0x3b9   :  { %2176 = vmatpush3.bf16.msra.mxu0 %v2220_v46 }
 0x3ba   :  { %2177 = vmatprep.subr.bf16.mxu0 %v2711_v0 }
 0x3bd   :  { %2178 = vmatpush3.bf16.msra.mxu0 %v2221_v47 }
 0x3be   :  { %2179 = vmatprep.subr.bf16.mxu0 %v2711_v0 }
 0x3c1   :  { %2180 = vmatpush3.bf16.msra.mxu0 %v2222_v48 }
 0x464   :  { %v501_v49 = vpop.f32.mrf.mxu0 }
 0x466   :  { %v2163_v50 = vpop.f32.mrf.mxu0 }
 0x468   :  { %v504_v51 = vpop.f32.mrf.mxu0 }
 0x469   :  { %v508_v52 = vpack.c.bf16 %v504_v51, %v501_v49 }
 0x46a   :  { %v2164_v53 = vpop.f32.mrf.mxu0 }
 0x46b   :  { %2182 = vmatmul.mubr.bf16.vlgmr.msra.gmra.mxu0 %v508_v52 }
 0x52b   :  { %v597_v54 = vpop.f32.mrf.mxu0 }
 0x52c   :  { %v598_v58 = vadd.f32 %v1916_v55, %v597_v54 }
 0x52d   :  { %v2183_v56 = vpop.f32.mrf.mxu0 }
 0x52f   :  { %v600_v57 = vpop.f32.mrf.mxu0 }
 0x530   :  { %v601_v59 = vadd.f32 %v1916_v55, %v600_v57 }
 0x531   :  { %v2184_v60 = vpop.f32.mrf.mxu0 }
 0x532   :  { %v2899_v61 = vpack.c.bf16 %v601_v59, %v598_v58 }
 0x534   :  { %2186 = vmatpush3.bf16.msra.mxu1 %v2899_v61 }
 0x537   :  { %2188 = vmatmul.mubr.msk.bf16.vlgmr.msra.gmra.mxu1 %vm217_vm1, %v2223_v62 }
 0x538   :  { %2599 = shalt.err (!%p2596_p7)  }
 0x539   :  { %168 = dma.hbm_to_vmem [thread:$0]  %s2966_s10, 2048, %s166_s1, [#allocation6] }
 0x53a   :  { %s2608_s9 = scalar_lea.vmem %s178_s5, 2048  ;;  %p2613_p9 = scmp.lt.s32.totalorder %s178_s5, %s178_s5 }
 0x53b   :  { %p2609_p8 = scmp.ne.s32.totalorder %s178_s5, %s2608_s9  ;;  %p2614_p10 = scmp.lt.s32.totalorder %s2608_s9, %s2608_s9 }
 0x53d   :  { %p2615_p11 = por %p2614_p10, %p2613_p9 }
 0x53f   :  { %p2616_p12 = pnand %p2615_p11, %p2609_p8 }
 0x541   :  { %2619 = shalt.err (!%p2616_p12)  }
 0x542   :  { %180 = dma.hbm_to_vmem [thread:$0]  %s2967_s11, 2048, %s178_s5, [#allocation6 + $0x1] }
 0x543   :  { %s2715_s16 = smov [#allocation4]   ;;  %s2716_s14 = smov [#allocation5]  }
 0x544   :  { %s189_s23 = sshll.u32 %s2715_s16, 4  ;;  %s201_s24 = sshll.u32 %s2716_s14, 4  ;;  %s190_s23 = int_to_ptr.vmem [resolvable:$true] %s189_s23  ;;  %s202_s24 = int_to_ptr.vmem [resolvable:$true] %s201_s24 }
 0x545   :  { %s2628_s26 = scalar_lea.vmem %s190_s23, 8192  ;;  %p2633_p0 = scmp.lt.s32.totalorder %s190_s23, %s190_s23 }
 0x546   :  { %p2629_p13 = scmp.ne.s32.totalorder %s190_s23, %s2628_s26  ;;  %p2634_p1 = scmp.lt.s32.totalorder %s2628_s26, %s2628_s26 }
 0x548   :  { %p2635_p2 = por %p2634_p1, %p2633_p0 }
 0x54a   :  { %p2636_p3 = pnand %p2635_p2, %p2629_p13 }
 0x54c   :  { %2639 = shalt.err (!%p2636_p3)  }
 0x54d   :  { %192 = dma.hbm_to_vmem [thread:$0]  %s2969_s13, 8192, %s190_s23, [#allocation6 + $0x2] }
 0x54e   :  { %s2648_s25 = scalar_lea.vmem %s202_s24, 4096  ;;  %p2653_p5 = scmp.lt.s32.totalorder %s202_s24, %s202_s24 }
 0x54f   :  { %p2649_p4 = scmp.ne.s32.totalorder %s202_s24, %s2648_s25  ;;  %p2654_p6 = scmp.lt.s32.totalorder %s2648_s25, %s2648_s25 }
 0x551   :  { %p2655_p7 = por %p2654_p6, %p2653_p5 }
 0x553   :  { %p2656_p8 = pnand %p2655_p7, %p2649_p4 }
 0x555   :  { %2659 = shalt.err (!%p2656_p8)  }
 0x556   :  { %204 = dma.hbm_to_vmem [thread:$0]  %s2971_s15, 4096, %s202_s24, [#allocation6 + $0x3] }
 0x5f7   :  { %v2915_v63 = vpop.f32.mrf.mxu1 }
 0x5f9   :  { %v2189_v0 = vpop.f32.mrf.mxu1 }
 0x5fb   :  { %v2917_v1 = vpop.f32.mrf.mxu1 }
 0x5fc   :  { %v656_v2 = vpack.c.bf16 %v2917_v1, %v2915_v63 }
 0x5fd   :  { %v2190_v3 = vpop.f32.mrf.mxu1 }
 0x5fe   :  { %2690 = dma.done.wait [#allocation6], 2048 }
 0x5ff   :  { %2691 = vsyncadd [#allocation6], 4294965248 }
 0x600   :  { %2692 = dma.done.wait [#allocation6 + $0x1], 2048 }
 0x601   :  { %2693 = vsyncadd [#allocation6 + $0x1], 4294965248  ;;  %v2717_v4 = vmov 0   ;;  %v2224_v5 = vld [vmem:[#allocation3 + $0x74] ss:$8 sps:$4 sm:$0xff]   ;;  %v943_v37 = vlaneseq }
 0x602   :  { %807 = vmatprep.mubr.bf16.mxu1 %v2717_v4  ;;  %930 = vmatprep.mubr.bf16.mxu0 %v2717_v4  ;;  %v2226_v6 = vld [vmem:[#allocation2 + $0x74] ss:$8 sps:$4 sm:$0xff]   ;;  %v2228_v7 = vld [vmem:[#allocation3 + $0x70] ss:$8 sps:$4 sm:$0xff]   ;;  %v2230_v9 = vld [vmem:[#allocation3 + $0x64] ss:$8 sps:$4 sm:$0xff]  }
 0x603   :  { %775 = vmatprep.subr.bf16.mxu1 %v2224_v5  ;;  %v2229_v8 = vld [vmem:[#allocation2 + $0x70] ss:$8 sps:$4 sm:$0xff]   ;;  %898 = vmatprep.subr.bf16.mxu0 %v2226_v6  ;;  %v2232_v10 = vld [vmem:[#allocation2 + $0x64] ss:$8 sps:$4 sm:$0xff]   ;;  %v2234_v11 = vld [vmem:[#allocation3 + $0x60] ss:$8 sps:$4 sm:$0xff]  }
 0x604   :  { %776 = vmatpush1.bf16.msra.mxu1 %v2228_v7  ;;  %899 = vmatpush1.bf16.msra.mxu0 %v2229_v8  ;;  %v2235_v12 = vld [vmem:[#allocation2 + $0x60] ss:$8 sps:$4 sm:$0xff]   ;;  %v2236_v13 = vld [vmem:[#allocation3 + $0x54] ss:$8 sps:$4 sm:$0xff]   ;;  %v2240_v15 = vld [vmem:[#allocation3 + $0x50] ss:$8 sps:$4 sm:$0xff]  }
 0x605   :  { %777 = vmatprep.subr.bf16.mxu1 %v2230_v9  ;;  %900 = vmatprep.subr.bf16.mxu0 %v2232_v10  ;;  %v2238_v14 = vld [vmem:[#allocation2 + $0x54] ss:$8 sps:$4 sm:$0xff]   ;;  %v2241_v16 = vld [vmem:[#allocation2 + $0x50] ss:$8 sps:$4 sm:$0xff]   ;;  %v2242_v17 = vld [vmem:[#allocation3 + $0x44] ss:$8 sps:$4 sm:$0xff]  }
 0x606   :  { %v2244_v18 = vld [vmem:[#allocation2 + $0x44] ss:$8 sps:$4 sm:$0xff]   ;;  %v2246_v19 = vld [vmem:[#allocation3 + $0x40] ss:$8 sps:$4 sm:$0xff]   ;;  %v2248_v21 = vld [vmem:[#allocation3 + $0x34] ss:$8 sps:$4 sm:$0xff]  }
 0x607   :  { %v2247_v20 = vld [vmem:[#allocation2 + $0x40] ss:$8 sps:$4 sm:$0xff]   ;;  %v2250_v22 = vld [vmem:[#allocation2 + $0x34] ss:$8 sps:$4 sm:$0xff]   ;;  %v2252_v23 = vld [vmem:[#allocation3 + $0x30] ss:$8 sps:$4 sm:$0xff]  }
 0x608   :  { %778 = vmatpush1.bf16.msra.mxu1 %v2234_v11  ;;  %901 = vmatpush1.bf16.msra.mxu0 %v2235_v12  ;;  %v2253_v24 = vld [vmem:[#allocation2 + $0x30] ss:$8 sps:$4 sm:$0xff]   ;;  %v2254_v25 = vld [vmem:[#allocation3 + $0x24] ss:$8 sps:$4 sm:$0xff]   ;;  %v2258_v27 = vld [vmem:[#allocation3 + $0x20] ss:$8 sps:$4 sm:$0xff]  }
 0x609   :  { %779 = vmatprep.subr.bf16.mxu1 %v2236_v13  ;;  %902 = vmatprep.subr.bf16.mxu0 %v2238_v14  ;;  %v2256_v26 = vld [vmem:[#allocation2 + $0x24] ss:$8 sps:$4 sm:$0xff]   ;;  %v2259_v28 = vld [vmem:[#allocation2 + $0x20] ss:$8 sps:$4 sm:$0xff]   ;;  %v2260_v29 = vld [vmem:[#allocation3 + $0x14] ss:$8 sps:$4 sm:$0xff]  }
 0x60a   :  { %v2262_v30 = vld [vmem:[#allocation2 + $0x14] ss:$8 sps:$4 sm:$0xff]   ;;  %v2264_v31 = vld [vmem:[#allocation3 + $0x10] ss:$8 sps:$4 sm:$0xff]   ;;  %v2266_v33 = vld [vmem:[#allocation3 + $0x4] ss:$8 sps:$4 sm:$0xff]  }
 0x60b   :  { %v2265_v32 = vld [vmem:[#allocation2 + $0x10] ss:$8 sps:$4 sm:$0xff]   ;;  %v2268_v34 = vld [vmem:[#allocation2 + $0x4] ss:$8 sps:$4 sm:$0xff]   ;;  %v2270_v35 = vld [vmem:[#allocation3] ss:$8 sps:$4 sm:$0xff]  }
 0x60c   :  { %780 = vmatpush1.bf16.msra.mxu1 %v2240_v15  ;;  %903 = vmatpush1.bf16.msra.mxu0 %v2241_v16  ;;  %v2271_v36 = vld [vmem:[#allocation2] ss:$8 sps:$4 sm:$0xff]   ;;  %v2928_v38 = vshrl.u32 %v943_v37, 7  ;;  %v941_v43 = vld [vmem:[#allocation18] sm:$0x3] }
 0x60d   :  { %781 = vmatprep.subr.bf16.mxu1 %v2242_v17  ;;  %904 = vmatprep.subr.bf16.mxu0 %v2244_v18 }
 0x60e   :  { %v949_v39 = vsub.s32 1, %v2928_v38  ;;  %v945_v42 = vsub.s32 0, %v2928_v38 }
 0x610   :  { %782 = vmatpush1.bf16.msra.mxu1 %v2246_v19  ;;  %905 = vmatpush1.bf16.msra.mxu0 %v2247_v20  ;;  %v950_v47 = vrot.slane %v941_v43, %v949_v39  ;;  %v946_v49 = vrot.slane %v941_v43, %v945_v42 }
 0x611   :  { %783 = vmatprep.subr.bf16.mxu1 %v2248_v21  ;;  %906 = vmatprep.subr.bf16.mxu0 %v2250_v22 }
 0x614   :  { %784 = vmatpush1.bf16.msra.mxu1 %v2252_v23  ;;  %907 = vmatpush1.bf16.msra.mxu0 %v2253_v24 }
 0x615   :  { %785 = vmatprep.subr.bf16.mxu1 %v2254_v25  ;;  %908 = vmatprep.subr.bf16.mxu0 %v2256_v26 }
 0x618   :  { %786 = vmatpush1.bf16.msra.mxu1 %v2258_v27  ;;  %909 = vmatpush1.bf16.msra.mxu0 %v2259_v28 }
 0x619   :  { %787 = vmatprep.subr.bf16.mxu1 %v2260_v29  ;;  %910 = vmatprep.subr.bf16.mxu0 %v2262_v30 }
 0x61c   :  { %788 = vmatpush1.bf16.msra.mxu1 %v2264_v31  ;;  %911 = vmatpush1.bf16.msra.mxu0 %v2265_v32 }
 0x61d   :  { %789 = vmatprep.subr.bf16.mxu1 %v2266_v33  ;;  %912 = vmatprep.subr.bf16.mxu0 %v2268_v34 }
 0x620   :  { %790 = vmatpush1.bf16.msra.mxu1 %v2270_v35  ;;  %913 = vmatpush1.bf16.msra.mxu0 %v2271_v36 }
 0x623   :  { %808 = vmatmul.mubr.bf16.vlgmr.msra.gmra.mxu1 %v2899_v61  ;;  %931 = vmatmul.mubr.bf16.vlgmr.msra.gmra.mxu0 %v656_v2  ;;  %v963_v2 = vld [vmem:[#allocation10] sm:$0x1] }
 0x624   :  { %999 = vmatprep.mubr.bf16.mxu1 %v2717_v4 }
 0x6e3   :  { %v809_v40 = vpop.f32.mrf.mxu1  ;;  %v932_v41 = vpop.f32.mrf.mxu0 }
 0x6e4   :  { %v933_v48 = vadd.f32 %v932_v41, %v809_v40 }
 0x6e5   :  { %v811_v44 = vpop.f32.mrf.mxu1  ;;  %v934_v45 = vpop.f32.mrf.mxu0 }
 0x6e6   :  { %v935_v46 = vadd.f32 %v934_v45, %v811_v44  ;;  %v953_v58 = vadd.f32 %v946_v49, %v933_v48 }
 0x6e7   :  { %v813_v50 = vpop.f32.mrf.mxu1  ;;  %v936_v51 = vpop.f32.mrf.mxu0 }
 0x6e8   :  { %v937_v52 = vadd.f32 %v936_v51, %v813_v50  ;;  %v954_v55 = vadd.f32 %v950_v47, %v935_v46  ;;  %v957_v63 = vmax.f32 %v953_v58, 0.0 }
 0x6e9   :  { %v815_v53 = vpop.f32.mrf.mxu1  ;;  %v938_v54 = vpop.f32.mrf.mxu0 }
 0x6ea   :  { %v955_v56 = vadd.f32 %v946_v49, %v937_v52  ;;  %v939_v57 = vadd.f32 %v938_v54, %v815_v53  ;;  %v958_v61 = vmax.f32 %v954_v55, 0.0 }
 0x6ec   :  { %v956_v59 = vadd.f32 %v950_v47, %v939_v57  ;;  %v959_v60 = vmax.f32 %v955_v56, 0.0 }
 0x6ee   :  { %v960_v62 = vmax.f32 %v956_v59, 0.0  ;;  %v961_v1 = vpack.c.bf16 %v959_v60, %v957_v63 }
 0x6f0   :  { %v962_v0 = vpack.c.bf16 %v960_v62, %v958_v61 }
 0x6f2   :  { %981 = vmatprep.subr.bf16.mxu1 %v962_v0 }
 0x6f3   :  { %982 = vmatpush1.bf16.msra.mxu1 %v961_v1 }
 0x6f6   :  { %1959 = vmatmul.mubr.msk.bf16.vlgmr.msra.gmra.mxu1 %vm217_vm1, %v963_v2 }
 0x7b6   :  { %v1001_v3 = vpop.f32.mrf.mxu1 }
 0x7b7   :  { %v2937_v4 = vpack.c.bf16 %v1001_v3, %v1001_v3 }
 0x7b8   :  { %v1003_v5 = vpop.f32.mrf.mxu1 }
 0x7b9   :  { %v1009_v6 = vpack.c.bf16 %v1003_v5, %v1003_v5 }
 0x7ba   :  { %v1005_v7 = vpop.f32.mrf.mxu1 }
 0x7bc   :  { %v1006_v8 = vpop.f32.mrf.mxu1 }
 0x7bd   :  { %2694 = dma.done.wait [#allocation6 + $0x2], 8192 }
 0x7be   :  { %2695 = vsyncadd [#allocation6 + $0x2], 4294959104  ;;  %1452 = vmatprep.mubr.bf16.mxu1 %v1009_v6  ;;  %1493 = vmatprep.mubr.bf16.mxu0 %v1009_v6  ;;  %v2272_v9 = vld [vmem:[#allocation4 + $0xe4] ss:$16 sps:$4 sm:$0xff]   ;;  %v2274_v10 = vld [vmem:[#allocation4 + $0xec] ss:$16 sps:$4 sm:$0xff]  }
 0x7bf   :  { %1420 = vmatprep.subr.bf16.mxu1 %v2272_v9  ;;  %v2276_v11 = vld [vmem:[#allocation4 + $0xe0] ss:$16 sps:$4 sm:$0xff]   ;;  %v2277_v12 = vld [vmem:[#allocation4 + $0xe8] ss:$16 sps:$4 sm:$0xff]   ;;  %1461 = vmatprep.subr.bf16.mxu0 %v2274_v10  ;;  %v2278_v13 = vld [vmem:[#allocation4 + $0xc4] ss:$16 sps:$4 sm:$0xff]  }
 0x7c0   :  { %1421 = vmatpush1.bf16.msra.mxu1 %v2276_v11  ;;  %1462 = vmatpush1.bf16.msra.mxu0 %v2277_v12  ;;  %v2280_v14 = vld [vmem:[#allocation4 + $0xcc] ss:$16 sps:$4 sm:$0xff]   ;;  %v2282_v15 = vld [vmem:[#allocation4 + $0xc0] ss:$16 sps:$4 sm:$0xff]   ;;  %v2283_v16 = vld [vmem:[#allocation4 + $0xc8] ss:$16 sps:$4 sm:$0xff]  }
 0x7c1   :  { %1422 = vmatprep.subr.bf16.mxu1 %v2278_v13  ;;  %1463 = vmatprep.subr.bf16.mxu0 %v2280_v14  ;;  %v2284_v17 = vld [vmem:[#allocation4 + $0xa4] ss:$16 sps:$4 sm:$0xff]   ;;  %v2286_v18 = vld [vmem:[#allocation4 + $0xac] ss:$16 sps:$4 sm:$0xff]   ;;  %v2288_v19 = vld [vmem:[#allocation4 + $0xa0] ss:$16 sps:$4 sm:$0xff]  }
 0x7c2   :  { %v2289_v20 = vld [vmem:[#allocation4 + $0xa8] ss:$16 sps:$4 sm:$0xff]   ;;  %v2290_v21 = vld [vmem:[#allocation4 + $0x84] ss:$16 sps:$4 sm:$0xff]   ;;  %v2292_v22 = vld [vmem:[#allocation4 + $0x8c] ss:$16 sps:$4 sm:$0xff]  }
 0x7c3   :  { %v2294_v23 = vld [vmem:[#allocation4 + $0x80] ss:$16 sps:$4 sm:$0xff]   ;;  %v2295_v24 = vld [vmem:[#allocation4 + $0x88] ss:$16 sps:$4 sm:$0xff]   ;;  %v2296_v25 = vld [vmem:[#allocation4 + $0x64] ss:$16 sps:$4 sm:$0xff]  }
 0x7c4   :  { %1423 = vmatpush1.bf16.msra.mxu1 %v2282_v15  ;;  %1464 = vmatpush1.bf16.msra.mxu0 %v2283_v16  ;;  %v2298_v26 = vld [vmem:[#allocation4 + $0x6c] ss:$16 sps:$4 sm:$0xff]   ;;  %v2300_v27 = vld [vmem:[#allocation4 + $0x60] ss:$16 sps:$4 sm:$0xff]   ;;  %v2301_v28 = vld [vmem:[#allocation4 + $0x68] ss:$16 sps:$4 sm:$0xff]  }
 0x7c5   :  { %1424 = vmatprep.subr.bf16.mxu1 %v2284_v17  ;;  %1465 = vmatprep.subr.bf16.mxu0 %v2286_v18  ;;  %v2302_v29 = vld [vmem:[#allocation4 + $0x44] ss:$16 sps:$4 sm:$0xff]   ;;  %v2304_v30 = vld [vmem:[#allocation4 + $0x4c] ss:$16 sps:$4 sm:$0xff]   ;;  %v2306_v31 = vld [vmem:[#allocation4 + $0x40] ss:$16 sps:$4 sm:$0xff]  }
 0x7c6   :  { %v2307_v32 = vld [vmem:[#allocation4 + $0x48] ss:$16 sps:$4 sm:$0xff]   ;;  %v2308_v33 = vld [vmem:[#allocation4 + $0x24] ss:$16 sps:$4 sm:$0xff]   ;;  %v2310_v34 = vld [vmem:[#allocation4 + $0x2c] ss:$16 sps:$4 sm:$0xff]  }
 0x7c7   :  { %v2312_v35 = vld [vmem:[#allocation4 + $0x20] ss:$16 sps:$4 sm:$0xff]   ;;  %v2313_v36 = vld [vmem:[#allocation4 + $0x28] ss:$16 sps:$4 sm:$0xff]   ;;  %v2314_v37 = vld [vmem:[#allocation4 + $0x4] ss:$16 sps:$4 sm:$0xff]  }
 0x7c8   :  { %1425 = vmatpush1.bf16.msra.mxu1 %v2288_v19  ;;  %1466 = vmatpush1.bf16.msra.mxu0 %v2289_v20  ;;  %v2316_v40 = vld [vmem:[#allocation4 + $0xc] ss:$16 sps:$4 sm:$0xff]   ;;  %v2318_v41 = vld [vmem:[#allocation4] ss:$16 sps:$4 sm:$0xff]   ;;  %v2319_v43 = vld [vmem:[#allocation4 + $0x8] ss:$16 sps:$4 sm:$0xff]  }
 0x7c9   :  { %1426 = vmatprep.subr.bf16.mxu1 %v2290_v21  ;;  %1467 = vmatprep.subr.bf16.mxu0 %v2292_v22  ;;  %v2320_v44 = vld [vmem:[#allocation4 + $0x1e4] ss:$16 sps:$4 sm:$0xff]   ;;  %v2322_v45 = vld [vmem:[#allocation4 + $0x1ec] ss:$16 sps:$4 sm:$0xff]   ;;  %v2324_v46 = vld [vmem:[#allocation4 + $0x1e0] ss:$16 sps:$4 sm:$0xff]  }
 0x7ca   :  { %v2325_v47 = vld [vmem:[#allocation4 + $0x1e8] ss:$16 sps:$4 sm:$0xff]   ;;  %v2326_v48 = vld [vmem:[#allocation4 + $0x1c4] ss:$16 sps:$4 sm:$0xff]   ;;  %v2328_v49 = vld [vmem:[#allocation4 + $0x1cc] ss:$16 sps:$4 sm:$0xff]  }
 0x7cb   :  { %v2330_v50 = vld [vmem:[#allocation4 + $0x1c0] ss:$16 sps:$4 sm:$0xff]   ;;  %v2331_v51 = vld [vmem:[#allocation4 + $0x1c8] ss:$16 sps:$4 sm:$0xff]   ;;  %v2332_v52 = vld [vmem:[#allocation4 + $0x1a4] ss:$16 sps:$4 sm:$0xff]  }
 0x7cc   :  { %1427 = vmatpush1.bf16.msra.mxu1 %v2294_v23  ;;  %1468 = vmatpush1.bf16.msra.mxu0 %v2295_v24  ;;  %v2334_v53 = vld [vmem:[#allocation4 + $0x1ac] ss:$16 sps:$4 sm:$0xff]   ;;  %v2336_v54 = vld [vmem:[#allocation4 + $0x1a0] ss:$16 sps:$4 sm:$0xff]   ;;  %v2337_v55 = vld [vmem:[#allocation4 + $0x1a8] ss:$16 sps:$4 sm:$0xff]  }
 0x7cd   :  { %1428 = vmatprep.subr.bf16.mxu1 %v2296_v25  ;;  %1469 = vmatprep.subr.bf16.mxu0 %v2298_v26  ;;  %v2338_v56 = vld [vmem:[#allocation4 + $0x184] ss:$16 sps:$4 sm:$0xff]   ;;  %v2340_v57 = vld [vmem:[#allocation4 + $0x18c] ss:$16 sps:$4 sm:$0xff]   ;;  %v2342_v58 = vld [vmem:[#allocation4 + $0x180] ss:$16 sps:$4 sm:$0xff]  }
 0x7ce   :  { %v2343_v59 = vld [vmem:[#allocation4 + $0x188] ss:$16 sps:$4 sm:$0xff]   ;;  %v2344_v60 = vld [vmem:[#allocation4 + $0x164] ss:$16 sps:$4 sm:$0xff]   ;;  %v2346_v61 = vld [vmem:[#allocation4 + $0x16c] ss:$16 sps:$4 sm:$0xff]  }
 0x7cf   :  { %v2348_v62 = vld [vmem:[#allocation4 + $0x160] ss:$16 sps:$4 sm:$0xff]   ;;  %v2349_v63 = vld [vmem:[#allocation4 + $0x168] ss:$16 sps:$4 sm:$0xff]   ;;  %v2350_v0 = vld [vmem:[#allocation4 + $0x144] ss:$16 sps:$4 sm:$0xff]  }
 0x7d0   :  { %1429 = vmatpush1.bf16.msra.mxu1 %v2300_v27  ;;  %1470 = vmatpush1.bf16.msra.mxu0 %v2301_v28  ;;  %v2352_v1 = vld [vmem:[#allocation4 + $0x14c] ss:$16 sps:$4 sm:$0xff]   ;;  %v2354_v2 = vld [vmem:[#allocation4 + $0x140] ss:$16 sps:$4 sm:$0xff]   ;;  %v2355_v3 = vld [vmem:[#allocation4 + $0x148] ss:$16 sps:$4 sm:$0xff]  }
 0x7d1   :  { %1430 = vmatprep.subr.bf16.mxu1 %v2302_v29  ;;  %1471 = vmatprep.subr.bf16.mxu0 %v2304_v30  ;;  %v2356_v5 = vld [vmem:[#allocation4 + $0x124] ss:$16 sps:$4 sm:$0xff]   ;;  %v2358_v6 = vld [vmem:[#allocation4 + $0x12c] ss:$16 sps:$4 sm:$0xff]   ;;  %v2360_v7 = vld [vmem:[#allocation4 + $0x120] ss:$16 sps:$4 sm:$0xff]  }
 0x7d2   :  { %v2361_v8 = vld [vmem:[#allocation4 + $0x128] ss:$16 sps:$4 sm:$0xff]   ;;  %v2362_v9 = vld [vmem:[#allocation4 + $0x104] ss:$16 sps:$4 sm:$0xff]   ;;  %v2364_v10 = vld [vmem:[#allocation4 + $0x10c] ss:$16 sps:$4 sm:$0xff]  }
 0x7d3   :  { %v2366_v11 = vld [vmem:[#allocation4 + $0x100] ss:$16 sps:$4 sm:$0xff]   ;;  %v2367_v12 = vld [vmem:[#allocation4 + $0x108] ss:$16 sps:$4 sm:$0xff]   ;;  %v1090_v13 = vsub.s32 2, %v2928_v38  ;;  %v1094_v15 = vsub.s32 3, %v2928_v38 }
 0x7d4   :  { %1431 = vmatpush1.bf16.msra.mxu1 %v2306_v31  ;;  %1472 = vmatpush1.bf16.msra.mxu0 %v2307_v32  ;;  %v1078_v14 = vld [vmem:[#allocation19] sm:$0xf] }
 0x7d5   :  { %1432 = vmatprep.subr.bf16.mxu1 %v2308_v33  ;;  %1473 = vmatprep.subr.bf16.mxu0 %v2310_v34  ;;  %v1083_v16 = vrot.slane %v1078_v14, %v945_v42  ;;  %v1091_v17 = vrot.slane %v1078_v14, %v1090_v13  ;;  %v1087_v18 = vrot.slane %v1078_v14, %v949_v39 }
 0x7d6   :  { %v1095_v19 = vrot.slane %v1078_v14, %v1094_v15 }
 0x7d8   :  { %1433 = vmatpush1.bf16.msra.mxu1 %v2312_v35  ;;  %1474 = vmatpush1.bf16.msra.mxu0 %v2313_v36 }
 0x7d9   :  { %1434 = vmatprep.subr.bf16.mxu1 %v2314_v37  ;;  %1475 = vmatprep.subr.bf16.mxu0 %v2316_v40 }
 0x7dc   :  { %1435 = vmatpush1.bf16.msra.mxu1 %v2318_v41  ;;  %1476 = vmatpush1.bf16.msra.mxu0 %v2319_v43 }
 0x7dd   :  { %1436 = vmatprep.subr.bf16.mxu1 %v2320_v44  ;;  %1477 = vmatprep.subr.bf16.mxu0 %v2322_v45 }
 0x7e0   :  { %1437 = vmatpush2.bf16.msra.mxu1 %v2324_v46  ;;  %1478 = vmatpush2.bf16.msra.mxu0 %v2325_v47 }
 0x7e1   :  { %1438 = vmatprep.subr.bf16.mxu1 %v2326_v48  ;;  %1479 = vmatprep.subr.bf16.mxu0 %v2328_v49 }
 0x7e4   :  { %1439 = vmatpush2.bf16.msra.mxu1 %v2330_v50  ;;  %1480 = vmatpush2.bf16.msra.mxu0 %v2331_v51 }
 0x7e5   :  { %1440 = vmatprep.subr.bf16.mxu1 %v2332_v52  ;;  %1481 = vmatprep.subr.bf16.mxu0 %v2334_v53 }
 0x7e8   :  { %1441 = vmatpush2.bf16.msra.mxu1 %v2336_v54  ;;  %1482 = vmatpush2.bf16.msra.mxu0 %v2337_v55 }
 0x7e9   :  { %1442 = vmatprep.subr.bf16.mxu1 %v2338_v56  ;;  %1483 = vmatprep.subr.bf16.mxu0 %v2340_v57 }
 0x7ec   :  { %1443 = vmatpush2.bf16.msra.mxu1 %v2342_v58  ;;  %1484 = vmatpush2.bf16.msra.mxu0 %v2343_v59 }
 0x7ed   :  { %1444 = vmatprep.subr.bf16.mxu1 %v2344_v60  ;;  %1485 = vmatprep.subr.bf16.mxu0 %v2346_v61 }
 0x7f0   :  { %1445 = vmatpush2.bf16.msra.mxu1 %v2348_v62  ;;  %1486 = vmatpush2.bf16.msra.mxu0 %v2349_v63 }
 0x7f1   :  { %1446 = vmatprep.subr.bf16.mxu1 %v2350_v0  ;;  %1487 = vmatprep.subr.bf16.mxu0 %v2352_v1 }
 0x7f4   :  { %1447 = vmatpush2.bf16.msra.mxu1 %v2354_v2  ;;  %1488 = vmatpush2.bf16.msra.mxu0 %v2355_v3 }
 0x7f5   :  { %1448 = vmatprep.subr.bf16.mxu1 %v2356_v5  ;;  %1489 = vmatprep.subr.bf16.mxu0 %v2358_v6 }
 0x7f8   :  { %1449 = vmatpush2.bf16.msra.mxu1 %v2360_v7  ;;  %1490 = vmatpush2.bf16.msra.mxu0 %v2361_v8 }
 0x7f9   :  { %1450 = vmatprep.subr.bf16.mxu1 %v2362_v9  ;;  %1491 = vmatprep.subr.bf16.mxu0 %v2364_v10 }
 0x7fc   :  { %1451 = vmatpush2.bf16.msra.mxu1 %v2366_v11  ;;  %1492 = vmatpush2.bf16.msra.mxu0 %v2367_v12 }
 0x7ff   :  { %1453 = vmatmul.mubr.bf16.vlgmr.msra.gmra.mxu1 %v2937_v4  ;;  %1494 = vmatmul.mubr.bf16.vlgmr.msra.gmra.mxu0 %v2937_v4 }
 0x8bf   :  { %v1454_v20 = vpop.f32.mrf.mxu1  ;;  %v1495_v21 = vpop.f32.mrf.mxu0 }
 0x8c0   :  { %v1455_v22 = vadd.f32 %v1454_v20, %v1083_v16  ;;  %v1496_v23 = vadd.f32 %v1495_v21, %v1091_v17 }
 0x8c1   :  { %v1456_v24 = vpop.f32.mrf.mxu1  ;;  %v1497_v25 = vpop.f32.mrf.mxu0 }
 0x8c2   :  { %v1502_v4 = vmax.f32 %v1455_v22, 0.0  ;;  %v1504_v26 = vmax.f32 %v1496_v23, 0.0  ;;  %v1457_v27 = vadd.f32 %v1456_v24, %v1087_v18  ;;  %v1498_v28 = vadd.f32 %v1497_v25, %v1095_v19 }
 0x8c3   :  { %v1458_v29 = vpop.f32.mrf.mxu1  ;;  %v1499_v30 = vpop.f32.mrf.mxu0 }
 0x8c4   :  { %v2947_v31 = vpack.c.bf16 %v1502_v4, %v1502_v4  ;;  %v2949_v42 = vpack.c.bf16 %v1504_v26, %v1504_v26  ;;  %v1503_v32 = vmax.f32 %v1457_v27, 0.0  ;;  %v1505_v38 = vmax.f32 %v1498_v28, 0.0 }
 0x8c5   :  { %v1459_v39 = vpop.f32.mrf.mxu1  ;;  %v1500_v33 = vpop.f32.mrf.mxu0 }
 0x8c6   :  { %v1507_v34 = vpack.c.bf16 %v1503_v32, %v1503_v32  ;;  %v1509_v35 = vpack.c.bf16 %v1505_v38, %v1505_v38 }
 0x8c7   :  { %2696 = dma.done.wait [#allocation6 + $0x3], 4096 }
 0x8c8   :  { %2697 = vsyncadd [#allocation6 + $0x3], 4294963200  ;;  %1809 = vmatprep.mubr.bf16.mxu1 %v1507_v34  ;;  %1849 = vmatprep.mubr.bf16.mxu0 %v1509_v35  ;;  %v2368_v36 = vld [vmem:[#allocation5 + $0x78] sm:$0xff]   ;;  %v2372_v43 = vld [vmem:[#allocation5 + $0x70] sm:$0xff]   ;;  %s2718_s13 = smov [#allocation22]  }
 0x8c9   :  { %v2369_v37 = vld [vmem:[#allocation5 + $0xf8] sm:$0xff]   ;;  %2085 = vmatprep.subr.bf16.mxu1 %v2368_v36  ;;  %v2373_v44 = vld [vmem:[#allocation5 + $0xf0] sm:$0xff]   ;;  %v2376_v47 = vld [vmem:[#allocation5 + $0x68] sm:$0xff]   ;;  %s1864_s15 = sshll.u32 %s2718_s13, 4  ;;  %s1865_s15 = int_to_ptr.vmem [resolvable:$true] %s1864_s15 }
 0x8ca   :  { %v2370_v40 = vld [vmem:[#allocation5 + $0x38] sm:$0xff]   ;;  %2107 = vmatprep.subr.bf16.mxu0 %v2369_v37  ;;  %v2374_v45 = vld [vmem:[#allocation5 + $0x30] sm:$0xff]   ;;  %v2377_v48 = vld [vmem:[#allocation5 + $0xe8] sm:$0xff]   ;;  %s2660_s3 = scalar_lea.vmem %s1865_s15, 32  ;;  %p2665_p10 = scmp.lt.s32.totalorder %s1865_s15, %s1865_s15 }
 0x8cb   :  { %v2371_v41 = vld [vmem:[#allocation5 + $0xb8] sm:$0xff]   ;;  %2086 = vmatpush3.bf16.msra.mxu1 %v2370_v40  ;;  %v2375_v46 = vld [vmem:[#allocation5 + $0xb0] sm:$0xff]   ;;  %v2378_v49 = vld [vmem:[#allocation5 + $0x28] sm:$0xff]   ;;  %p2661_p9 = scmp.ne.s32.totalorder %s1865_s15, %s2660_s3  ;;  %p2666_p11 = scmp.lt.s32.totalorder %s2660_s3, %s2660_s3 }
 0x8cc   :  { %2108 = vmatpush3.bf16.msra.mxu0 %v2371_v41  ;;  %2087 = vmatprep.subr.bf16.mxu1 %v2372_v43  ;;  %v2379_v50 = vld [vmem:[#allocation5 + $0xa8] sm:$0xff]   ;;  %v2380_v51 = vld [vmem:[#allocation5 + $0x60] sm:$0xff]   ;;  %v2384_v55 = vld [vmem:[#allocation5 + $0x58] sm:$0xff]  }
 0x8cd   :  { %2109 = vmatprep.subr.bf16.mxu0 %v2373_v44  ;;  %v2381_v52 = vld [vmem:[#allocation5 + $0xe0] sm:$0xff]   ;;  %v2385_v56 = vld [vmem:[#allocation5 + $0xd8] sm:$0xff]   ;;  %v2388_v59 = vld [vmem:[#allocation5 + $0x50] sm:$0xff]   ;;  %p2667_p12 = por %p2666_p11, %p2665_p10 }
 0x8ce   :  { %v2382_v53 = vld [vmem:[#allocation5 + $0x20] sm:$0xff]   ;;  %v2386_v57 = vld [vmem:[#allocation5 + $0x18] sm:$0xff]   ;;  %v2389_v60 = vld [vmem:[#allocation5 + $0xd0] sm:$0xff]  }
 0x8cf   :  { %2088 = vmatpush3.bf16.msra.mxu1 %v2374_v45  ;;  %v2383_v54 = vld [vmem:[#allocation5 + $0xa0] sm:$0xff]   ;;  %v2387_v58 = vld [vmem:[#allocation5 + $0x98] sm:$0xff]   ;;  %v2390_v61 = vld [vmem:[#allocation5 + $0x10] sm:$0xff]   ;;  %p2668_p13 = pnand %p2667_p12, %p2661_p9 }
 0x8d0   :  { %2110 = vmatpush3.bf16.msra.mxu0 %v2375_v46  ;;  %2089 = vmatprep.subr.bf16.mxu1 %v2376_v47  ;;  %v2391_v62 = vld [vmem:[#allocation5 + $0x90] sm:$0xff]   ;;  %v2392_v63 = vld [vmem:[#allocation5 + $0x48] sm:$0xff]   ;;  %v2396_v3 = vld [vmem:[#allocation5 + $0x40] sm:$0xff]  }
 0x8d1   :  { %2111 = vmatprep.subr.bf16.mxu0 %v2377_v48  ;;  %v2393_v0 = vld [vmem:[#allocation5 + $0xc8] sm:$0xff]   ;;  %v2397_v5 = vld [vmem:[#allocation5 + $0xc0] sm:$0xff]   ;;  %v2024_v10 = vld [vmem:[#allocation21] ss:$0 sm:$0xff] }
 0x8d2   :  { %v2394_v1 = vld [vmem:[#allocation5 + $0x8] sm:$0xff]   ;;  %v2398_v6 = vld [vmem:[#allocation5] sm:$0xff]  }
 0x8d3   :  { %2090 = vmatpush3.bf16.msra.mxu1 %v2378_v49  ;;  %v2395_v2 = vld [vmem:[#allocation5 + $0x88] sm:$0xff]   ;;  %v2399_v7 = vld [vmem:[#allocation5 + $0x80] sm:$0xff]  }
 0x8d4   :  { %2112 = vmatpush3.bf16.msra.mxu0 %v2379_v50  ;;  %2091 = vmatprep.subr.bf16.mxu1 %v2380_v51 }
 0x8d5   :  { %2113 = vmatprep.subr.bf16.mxu0 %v2381_v52 }
 0x8d7   :  { %2092 = vmatpush3.bf16.msra.mxu1 %v2382_v53 }
 0x8d8   :  { %2114 = vmatpush3.bf16.msra.mxu0 %v2383_v54  ;;  %2093 = vmatprep.subr.bf16.mxu1 %v2384_v55 }
 0x8d9   :  { %2115 = vmatprep.subr.bf16.mxu0 %v2385_v56 }
 0x8db   :  { %2094 = vmatpush3.bf16.msra.mxu1 %v2386_v57 }
 0x8dc   :  { %2116 = vmatpush3.bf16.msra.mxu0 %v2387_v58  ;;  %2095 = vmatprep.subr.bf16.mxu1 %v2388_v59 }
 0x8dd   :  { %2117 = vmatprep.subr.bf16.mxu0 %v2389_v60 }
 0x8df   :  { %2096 = vmatpush3.bf16.msra.mxu1 %v2390_v61 }
 0x8e0   :  { %2118 = vmatpush3.bf16.msra.mxu0 %v2391_v62  ;;  %2097 = vmatprep.subr.bf16.mxu1 %v2392_v63 }
 0x8e1   :  { %2119 = vmatprep.subr.bf16.mxu0 %v2393_v0 }
 0x8e3   :  { %2098 = vmatpush3.bf16.msra.mxu1 %v2394_v1 }
 0x8e4   :  { %2120 = vmatpush3.bf16.msra.mxu0 %v2395_v2  ;;  %2099 = vmatprep.subr.bf16.mxu1 %v2396_v3 }
 0x8e5   :  { %2121 = vmatprep.subr.bf16.mxu0 %v2397_v5 }
 0x8e7   :  { %2100 = vmatpush3.bf16.msra.mxu1 %v2398_v6 }
 0x8e8   :  { %2122 = vmatpush3.bf16.msra.mxu0 %v2399_v7 }
 0x8ea   :  { %1810 = vmatmul.mubr.bf16.vlgmr.msra.gmra.mxu1 %v2947_v31 }
 0x8eb   :  { %1850 = vmatmul.mubr.bf16.vlgmr.msra.gmra.mxu0 %v2949_v42 }
 0x9aa   :  { %v2101_v8 = vpop.f32.mrf.mxu1 }
 0x9ab   :  { %v2123_v9 = vpop.f32.mrf.mxu0 }
 0x9ac   :  { %v2102_v11 = vpop.f32.mrf.mxu1 }
 0x9ad   :  { %v2103_v12 = vadd.f32 %v2102_v11, %v2101_v8  ;;  %v2124_v13 = vpop.f32.mrf.mxu0 }
 0x9ae   :  { %v2104_v14 = vpop.f32.mrf.mxu1  ;;  %v2125_v16 = vadd.f32 %v2124_v13, %v2123_v9 }
 0x9af   :  { %v1812_v15 = vadd.f32 %v2103_v12, %v2024_v10  ;;  %v2126_v17 = vpop.f32.mrf.mxu0 }
 0x9b0   :  { %v2105_v18 = vpop.f32.mrf.mxu1 }
 0x9b1   :  { %v1852_v19 = vadd.f32 %v2125_v16, %v1812_v15  ;;  %v2127_v20 = vpop.f32.mrf.mxu0 }
 0x9b3   :  { %1857 = vst [vmem:[#allocation22] sm:$0x3] %v1852_v19 }
 0x9b4   :  { %2671 = shalt.err (!%p2668_p13)
}
 0x9b5   :  { %1867 = dma.vmem_to_hbm [thread:$0]  %s1865_s15, 32, %s2973_s17, [#allocation9]  }
 0x9b6   :  { %2698 = dma.done.wait [#allocation9], 32  }
 0x9b7   :  { %2699 = vsyncadd [#allocation9], 4294967264 }
 0x9b8   :  { %1871 = vsyncpa [#allocation8], 1 }
 0x9b9   :  { %1872 = vsyncpa [#allocation11], 1 }
 0x9ba   :  { %1873 = vsyncpa [#allocation14], 1 }
 0x9bb   :  { %1874 = vsyncpa [#allocation17], 1 }
 0x9bc   :  { %1875 = vsyncpa [#allocation20], 1 }
 0x9bd   :  { %1876 = vsyncpa [#allocation9], 1 }
 0x9be   :  { %1877 = vsyncmov [#allocation6] }
 0x9c1   :  { %s1878_s7 = vpop.sfrf %1877 }
 0x9c2   :  { %p2057_p0 = scmp.ne.s32.totalorder %s1878_s7, 0 }
 0x9c4   :  { %1882 = shalt.err (%p2057_p0)  }
 0x9c5   :  { %1884 = vsyncmov [#allocation6 + $0x1] }
 0x9c8   :  { %s1885_s27 = vpop.sfrf %1884 }
 0x9c9   :  { %p2058_p1 = scmp.ne.s32.totalorder %s1885_s27, 0 }
 0x9cb   :  { %1889 = shalt.err (%p2058_p1)  }
 0x9cc   :  { %1891 = vsyncmov [#allocation6 + $0x2] }
 0x9cf   :  { %s1892_s0 = vpop.sfrf %1891 }
 0x9d0   :  { %p2059_p2 = scmp.ne.s32.totalorder %s1892_s0, 0 }
 0x9d2   :  { %1896 = shalt.err (%p2059_p2)  }
 0x9d3   :  { %1898 = vsyncmov [#allocation6 + $0x3] }
 0x9d6   :  { %s1899_s17 = vpop.sfrf %1898 }
 0x9d7   :  { %p2060_p3 = scmp.ne.s32.totalorder %s1899_s17, 0 }
 0x9d9   :  { %1903 = shalt.err (%p2060_p3)  }

</bundles_post_ra>
